<compile_context>
chip_gen: v7x
topology: tpu7x:2x2x1
jax: 0.10.0
libtpu: 0.0.40
codegen_flags: <defaults>
</compile_context>

<pallas_src>
import functools
import math

import jax
import jax.numpy as jnp
from jax.experimental import pallas as pl
from jax.experimental.pallas import tpu as pltpu

_LN_EPS = 1e-5
_SUBLANE = 8
_LANE = 128


def _round_up(a, m):
    return ((a + m - 1) // m) * m


# ------------------------------ in-kernel math ------------------------------- #

def _gelu_exact(x):
    """torch.nn.GELU() default: 0.5*x*(1+erf(x/sqrt(2))).

    erf via Abramowitz & Stegun 7.1.26 (|err| ~ 1.5e-7).  exp() lands on the EUP
    slot; the Horner chain is a few VPU FMAs.  Exact divide kept for the 5e-5 match.
    """
    z = x * 0.7071067811865476
    az = jnp.abs(z)
    t = 1.0 / (1.0 + 0.3275911 * az)
    poly = ((((1.061405429 * t - 1.453152027) * t + 1.421413741) * t
             - 0.284496736) * t + 0.254829592) * t
    half_erfc = 0.5 * poly * jnp.exp(-az * az)            # = 0.5*erfc(|z|)
    phi = jnp.where(z >= 0.0, 1.0 - half_erfc, half_erfc)  # = 0.5*(1+erf(z))
    return x * phi


# ---------------------------------- kernel ----------------------------------- #

def _resblock_kernel(x_ref, bitm_ref,
                     tap1_ref, dwb1_ref, lnw1_ref, lnb1_ref, rm1_ref, pww1_ref, pwb1_ref,
                     tap2_ref, dwb2_ref, lnw2_ref, lnb2_ref, rm2_ref, pww2_ref, pwb2_ref,
                     o_ref, *, K, pad, L, B_tile, n_bits, pow2,
                     inv_n1, inv_n2, use_rowmask1, use_rowmask2, add_residual):
    """One batch chunk: x is (C_in_p, P) with P = B_tile*L (samples laid side by
    side on lanes, channels on sublanes).  All weights/masks arrive pre-padded,
    pre-masked and pre-tiled (grid-invariant, resident via constant index maps)."""
    x = x_ref[0]                               # (C_in_p, P)
    P = x.shape[1]
    bitm = bitm_ref[...]                       # (n_bits, P) {0,1} f32

    def seg_allreduce(row):
        """(1,P) -> (1,P): per-sample (aligned L-lane segment) sum, broadcast back."""
        if pow2:
            r = row
            for k in range(n_bits):            # recursive doubling on the XLU
                s = 1 << k
                r_plus = pltpu.roll(r, shift=P - s, axis=1)   # value of lane i+s
                r_minus = pltpu.roll(r, shift=s, axis=1)      # value of lane i-s
                m = bitm[k:k + 1, :]            # 1 where bit k of (lane % L) == 0
                r = r + r_minus + m * (r_plus - r_minus)
            return r
        # Fallback (non-power-of-two L): masked per-segment reduce (rare path).
        lane = jax.lax.broadcasted_iota(jnp.int32, (1, P), 1)
        seg = lane // L
        out = jnp.zeros_like(row)
        for si in range(B_tile):
            msk = (seg == si).astype(row.dtype)
            out = out + msk * jnp.sum(row[:, si * L:(si + 1) * L])
        return out

    def dwconv(xin, tap_ref, b_ref):
        # 'same'-padded depthwise conv: per-tap lane rotation (XLU) times a
        # boundary-pre-masked weight plane (wrapped lanes contribute exactly 0).
        acc = None
        for k in range(K):
            d = k - pad
            win = xin if d == 0 else pltpu.roll(xin, shift=(-d) % P, axis=1)
            term = tap_ref[k] * win
            acc = term if acc is None else acc + term
        return acc + b_ref[...]

    def layernorm(xin, w_ref, b_ref, rm_ref, inv_n, use_rowmask):
        # LayerNorm(normalized_shape=(C, L)) per sample; exact f32 statistics
        # (inv_n uses the true C; padded channel rows are zero / masked out).
        mean = seg_allreduce(jnp.sum(xin, axis=0, keepdims=True)) * inv_n
        xc = xin - mean
        sq = xc * xc
        if use_rowmask:                         # drop zero-padded channel rows
            sq = sq * rm_ref[...]
        var = seg_allreduce(jnp.sum(sq, axis=0, keepdims=True)) * inv_n
        return xc * jax.lax.rsqrt(var + _LN_EPS) * w_ref[...] + b_ref[...]

    def pwconv(xin, w_ref, b_ref):
        # 1x1 conv as an unrolled exact-f32 VPU MAC over the tiny C_in (4-8).
        # TODO(synk): for channel counts >=128 switch to an MXU matmul (bf16
        # operands, preferred_element_type=f32, 128-(v5e)/256-(v6e,v7x) padded
        # tiles) and re-check VMEM (v7x has 64 MiB, not 128).
        w = w_ref[...]
        acc = None
        for ci in range(xin.shape[0]):
            term = w[:, ci:ci + 1] * xin[ci:ci + 1, :]
            acc = term if acc is None else acc + term
        return acc + b_ref[...]

    y = dwconv(x, tap1_ref, dwb1_ref)
    y = layernorm(y, lnw1_ref, lnb1_ref, rm1_ref, inv_n1, use_rowmask1)
    y = _gelu_exact(pwconv(y, pww1_ref, pwb1_ref))
    y = dwconv(y, tap2_ref, dwb2_ref)
    y = layernorm(y, lnw2_ref, lnb2_ref, rm2_ref, inv_n2, use_rowmask2)
    y = _gelu_exact(pwconv(y, pww2_ref, pwb2_ref))
    if add_residual:
        y = x + y                               # FloatFunctional.add == plain add
    o_ref[0] = y.astype(o_ref.dtype)


# --------------------------------- wrapper ------------------------------------ #

@functools.partial(jax.jit,
                   static_argnames=("kernel_size", "residual_connection", "lane_target"))
def resblock_forward(x, params, *, kernel_size, residual_connection, lane_target=512):
    """x: (B, C_in, L) f32 (NCL).  Returns (B, C_out, L) f32."""
    B, c_in, L = x.shape
    c_mid = params["pw1_w"].shape[0]
    c_out = params["pw2_w"].shape[0]
    assert kernel_size % 2 == 1, "ResBlock kernel_size must be odd"
    pad = (kernel_size - 1) // 2
    add_residual = (c_in == c_out) and residual_connection

    # Channels zero-padded to full 8-sublane vregs (zero rows; LN stays exact).
    c_in_p, c_mid_p, c_out_p = (_round_up(c, _SUBLANE) for c in (c_in, c_mid, c_out))

    # Lane tiling: P = B_tile*L is an exact multiple of 128 (unmasked vst) and
    # >= lane_target where the batch allows; shrink to keep >= 2 grid steps so
    # both v7x TensorCores get work via the "parallel" axis.
    b0 = math.lcm(L, _LANE) // L
    B_tile = min(max(b0, _round_up(pl.cdiv(lane_target, L), b0)),
                 _round_up(B, b0))
    if pl.cdiv(B, B_tile) < 2 and B > b0:
        B_tile = max(b0, ((B - 1) // b0) * b0)
    n_chunks = int(pl.cdiv(B, B_tile))
    B_pad = n_chunks * B_tile
    P = B_tile * L

    # ---- grid-invariant constants (hoisted; resident via constant index maps) ----
    lpos = jnp.arange(P, dtype=jnp.int32) % L          # position within a sample
    pow2 = (L & (L - 1)) == 0
    n_bits = (L.bit_length() - 1) if pow2 else 0
    if n_bits > 0:
        bitm = jnp.stack([(((lpos >> k) & 1) == 0).astype(jnp.float32)
                          for k in range(n_bits)], axis=0)
    else:
        bitm = jnp.ones((1, P), jnp.float32)            # dummy (unused)

    def pad_rows(a, n):
        return jnp.pad(a, ((0, n - a.shape[0]),) + ((0, 0),) * (a.ndim - 1))

    def tap_planes(dw_w_p):   # (C_p, K) -> (K, C_p, P), sample-boundary pre-masked
        planes = []
        for k in range(kernel_size):
            d = k - pad
            m = ((lpos + d >= 0) & (lpos + d < L)).astype(jnp.float32)   # (P,)
            planes.append(dw_w_p[:, k][:, None] * m[None, :])
        return jnp.stack(planes, axis=0)

    dw1 = pad_rows(params["dw1_w"], c_in_p)
    dw2 = pad_rows(params["dw2_w"], c_mid_p)
    plist = [
        bitm,
        # layer 1
        tap_planes(dw1), pad_rows(params["dw1_b"], c_in_p),
        jnp.tile(pad_rows(params["ln1_w"], c_in_p), (1, B_tile)),
        jnp.tile(pad_rows(params["ln1_b"], c_in_p), (1, B_tile)),
        (jnp.arange(c_in_p) < c_in).astype(jnp.float32)[:, None],
        jnp.pad(params["pw1_w"], ((0, c_mid_p - c_mid), (0, c_in_p - c_in))),
        pad_rows(params["pw1_b"], c_mid_p),
        # layer 2
        tap_planes(dw2), pad_rows(params["dw2_b"], c_mid_p),
        jnp.tile(pad_rows(params["ln2_w"], c_mid_p), (1, B_tile)),
        jnp.tile(pad_rows(params["ln2_b"], c_mid_p), (1, B_tile)),
        (jnp.arange(c_mid_p) < c_mid).astype(jnp.float32)[:, None],
        jnp.pad(params["pw2_w"], ((0, c_out_p - c_out), (0, c_mid_p - c_mid))),
        pad_rows(params["pw2_b"], c_out_p),
    ]

    # Fold batch onto lanes: (B_pad, C_p, L) -> (chunks, C_p, B_tile*L).
    # TODO(synk): when stacking ResBlocks, hoist this fold/unfold (and the channel
    # pad) across the whole stack to cut extra HBM round trips (matters most on v5e).
    x_p = jnp.pad(x, ((0, B_pad - B), (0, c_in_p - c_in), (0, 0)))
    x_f = (x_p.reshape(n_chunks, B_tile, c_in_p, L)
              .transpose(0, 2, 1, 3)
              .reshape(n_chunks, c_in_p, P))

    kernel = functools.partial(
        _resblock_kernel, K=kernel_size, pad=pad, L=L, B_tile=B_tile,
        n_bits=n_bits, pow2=pow2,
        inv_n1=1.0 / float(c_in * L), inv_n2=1.0 / float(c_mid * L),
        use_rowmask1=(c_in_p != c_in), use_rowmask2=(c_mid_p != c_mid),
        add_residual=add_residual)

    def const_spec(a):
        zeros = (0,) * a.ndim
        return pl.BlockSpec(a.shape, lambda i, z=zeros: z)

    # Blocks are tiny (C_p*P f32 each): far below scoped VMEM on v5e/v6e (32/128 MiB)
    # and v7x (64 MiB).  Re-check if C/L are scaled up.
    out = pl.pallas_call(
        kernel,
        out_shape=jax.ShapeDtypeStruct((n_chunks, c_out_p, P), jnp.float32),
        grid=(n_chunks,),
        in_specs=[pl.BlockSpec((1, c_in_p, P), lambda i: (i, 0, 0))]
                 + [const_spec(p) for p in plist],
        out_specs=pl.BlockSpec((1, c_out_p, P), lambda i: (i, 0, 0)),
        compiler_params=pltpu.CompilerParams(
            dimension_semantics=("parallel",)),
    )(x_f, *plist)

    out = (out.reshape(n_chunks, c_out_p, B_tile, L)
              .transpose(0, 2, 1, 3)
              .reshape(B_pad, c_out_p, L))
    return out[:B, :c_out]


# ----------------------------- reference (plain JAX) --------------------------- #

def resblock_reference(x, params, *, kernel_size, residual_connection):
    """Straightforward per-sample NCL reference (exact f32, true erf GELU)."""
    pad = (kernel_size - 1) // 2

    def sep(xin, dw_w, dw_b, ln_w, ln_b, pw_w, pw_b):
        Bb, C, Ll = xin.shape
        xp = jnp.pad(xin, ((0, 0), (0, 0), (pad, pad)))
        y = jnp.broadcast_to(dw_b[None, :, :], (Bb, C, Ll)).astype(jnp.float32)
        for k in range(kernel_size):
            y = y + dw_w[None, :, k:k + 1] * xp[:, :, k:k + Ll]
        mean = jnp.mean(y, axis=(1, 2), keepdims=True)
        yc = y - mean
        var = jnp.mean(yc * yc, axis=(1, 2), keepdims=True)
        y = yc * jax.lax.rsqrt(var + _LN_EPS) * ln_w[None] + ln_b[None]
        y = (pw_w[None, :, :, None] * y[:, None, :, :]).sum(axis=2) + pw_b[None, :, :]
        return jax.nn.gelu(y, approximate=False)

    y = sep(x, params["dw1_w"], params["dw1_b"], params["ln1_w"], params["ln1_b"],
            params["pw1_w"], params["pw1_b"])
    y = sep(y, params["dw2_w"], params["dw2_b"], params["ln2_w"], params["ln2_b"],
            params["pw2_w"], params["pw2_b"])
    if (x.shape[1] == y.shape[1]) and residual_connection:
        y = x + y
    return y


# ------------------------------------ main ------------------------------------- #

def _make_params(key, input_length, in_ch, mid_ch, out_ch, kernel_size):
    ks = jax.random.split(key, 12)
    f32 = jnp.float32
    return {
        # layer1: SeparableConv1D(in_ch -> mid_ch)
        "dw1_w": 0.1 * jax.random.normal(ks[0], (in_ch, kernel_size), f32),
        "dw1_b": 0.1 * jax.random.normal(ks[1], (in_ch, 1), f32),
        "ln1_w": 1.0 + 0.1 * jax.random.normal(ks[2], (in_ch, input_length), f32),
        "ln1_b": 0.1 * jax.random.normal(ks[3], (in_ch, input_length), f32),
        "pw1_w": 0.1 * jax.random.normal(ks[4], (mid_ch, in_ch), f32),
        "pw1_b": 0.1 * jax.random.normal(ks[5], (mid_ch, 1), f32),
        # layer2: SeparableConv1D(mid_ch -> out_ch)
        "dw2_w": 0.1 * jax.random.normal(ks[6], (mid_ch, kernel_size), f32),
        "dw2_b": 0.1 * jax.random.normal(ks[7], (mid_ch, 1), f32),
        "ln2_w": 1.0 + 0.1 * jax.random.normal(ks[8], (mid_ch, input_length), f32),
        "ln2_b": 0.1 * jax.random.normal(ks[9], (mid_ch, input_length), f32),
        "pw2_w": 0.1 * jax.random.normal(ks[10], (out_ch, mid_ch), f32),
        "pw2_b": 0.1 * jax.random.normal(ks[11], (out_ch, 1), f32),
    }


if __name__ == "__main__":
    # ResBlock(input_length=16, in_channels=4, mid_channels=8, out_channels=4,
    #          kernel_size=3, residual_connection=True)
    L = 16
    in_ch, mid_ch, out_ch, K = 4, 8, 4, 3

    key = jax.random.PRNGKey(0)
    k_x, k_x2, k_p = jax.random.split(key, 3)
    params = _make_params(k_p, L, in_ch, mid_ch, out_ch, K)

    # Primary small check (B=2) plus a multi-chunk check (B=20) that exercises
    # batch padding and the >=2-grid-step (v7x) path.
    for name, B, kx in (("small", 2, k_x), ("multichunk", 20, k_x2)):
        x = jax.random.normal(kx, (B, in_ch, L), jnp.float32)
        out = jax.block_until_ready(
            resblock_forward(x, params, kernel_size=K, residual_connection=True))
        ref = resblock_reference(x, params, kernel_size=K, residual_connection=True)
        assert out.shape == (B, out_ch, L)
        assert bool(jnp.allclose(out, ref, atol=5e-5, rtol=5e-5)), f"mismatch ({name})"

    print("KERNEL_OK")
</pallas_src>

<mosaic_0001>
module attributes {stable_mosaic.version = 11 : i64} {
  func.func @_resblock_kernel(%arg0: i32, %arg1: memref<1x8x128xf32, #tpu.memory_space<vmem>>, %arg2: memref<4x128xf32, #tpu.memory_space<vmem>>, %arg3: memref<3x8x128xf32, #tpu.memory_space<vmem>>, %arg4: memref<8x1xf32, #tpu.memory_space<vmem>>, %arg5: memref<8x128xf32, #tpu.memory_space<vmem>>, %arg6: memref<8x128xf32, #tpu.memory_space<vmem>>, %arg7: memref<8x1xf32, #tpu.memory_space<vmem>>, %arg8: memref<8x8xf32, #tpu.memory_space<vmem>>, %arg9: memref<8x1xf32, #tpu.memory_space<vmem>>, %arg10: memref<3x8x128xf32, #tpu.memory_space<vmem>>, %arg11: memref<8x1xf32, #tpu.memory_space<vmem>>, %arg12: memref<8x128xf32, #tpu.memory_space<vmem>>, %arg13: memref<8x128xf32, #tpu.memory_space<vmem>>, %arg14: memref<8x1xf32, #tpu.memory_space<vmem>>, %arg15: memref<8x8xf32, #tpu.memory_space<vmem>>, %arg16: memref<8x1xf32, #tpu.memory_space<vmem>>, %arg17: memref<1x8x128xf32, #tpu.memory_space<vmem>>) attributes {dimension_semantics = [#tpu.dimension_semantics<parallel>], iteration_bounds = array<i64: 1>, scalar_prefetch = 0 : i64, scratch_operands = 0 : i64, tpu.core_type = #tpu.core_type<tc>, window_params = [{transform_indices = @transform_0, window_bounds = array<i64: 1, 8, 128>}, {pipeline_mode = #tpu.pipeline_mode<synchronous>, transform_indices = @transform_1, window_bounds = array<i64: 4, 128>}, {pipeline_mode = #tpu.pipeline_mode<synchronous>, transform_indices = @transform_2, window_bounds = array<i64: 3, 8, 128>}, {pipeline_mode = #tpu.pipeline_mode<synchronous>, transform_indices = @transform_3, window_bounds = array<i64: 8, 1>}, {pipeline_mode = #tpu.pipeline_mode<synchronous>, transform_indices = @transform_4, window_bounds = array<i64: 8, 128>}, {pipeline_mode = #tpu.pipeline_mode<synchronous>, transform_indices = @transform_5, window_bounds = array<i64: 8, 128>}, {pipeline_mode = #tpu.pipeline_mode<synchronous>, transform_indices = @transform_6, window_bounds = array<i64: 8, 1>}, {pipeline_mode = #tpu.pipeline_mode<synchronous>, transform_indices = @transform_7, window_bounds = array<i64: 8, 8>}, {pipeline_mode = #tpu.pipeline_mode<synchronous>, transform_indices = @transform_8, window_bounds = array<i64: 8, 1>}, {pipeline_mode = #tpu.pipeline_mode<synchronous>, transform_indices = @transform_9, window_bounds = array<i64: 3, 8, 128>}, {pipeline_mode = #tpu.pipeline_mode<synchronous>, transform_indices = @transform_10, window_bounds = array<i64: 8, 1>}, {pipeline_mode = #tpu.pipeline_mode<synchronous>, transform_indices = @transform_11, window_bounds = array<i64: 8, 128>}, {pipeline_mode = #tpu.pipeline_mode<synchronous>, transform_indices = @transform_12, window_bounds = array<i64: 8, 128>}, {pipeline_mode = #tpu.pipeline_mode<synchronous>, transform_indices = @transform_13, window_bounds = array<i64: 8, 1>}, {pipeline_mode = #tpu.pipeline_mode<synchronous>, transform_indices = @transform_14, window_bounds = array<i64: 8, 8>}, {pipeline_mode = #tpu.pipeline_mode<synchronous>, transform_indices = @transform_15, window_bounds = array<i64: 8, 1>}, {transform_indices = @transform_16, window_bounds = array<i64: 1, 8, 128>}]} {
    %c0 = arith.constant 0 : index
    %c0_0 = arith.constant 0 : index
    %c0_1 = arith.constant 0 : index
    %0 = vector.load %arg1[%c0, %c0_0, %c0_1] : memref<1x8x128xf32, #tpu.memory_space<vmem>>, vector<1x8x128xf32>
    %1 = vector.shape_cast %0 : vector<1x8x128xf32> to vector<8x128xf32>
    %c0_2 = arith.constant 0 : index
    %c0_3 = arith.constant 0 : index
    %2 = vector.load %arg2[%c0_2, %c0_3] : memref<4x128xf32, #tpu.memory_space<vmem>>, vector<4x128xf32>
    %c1_i32 = arith.constant 1 : i32
    %3 = tpu.dynamic_rotate %1 by %c1_i32 dim 1 : vector<8x128xf32>, i32 -> vector<8x128xf32>
    %c0_4 = arith.constant 0 : index
    %c0_5 = arith.constant 0 : index
    %c0_6 = arith.constant 0 : index
    %4 = vector.load %arg3[%c0_4, %c0_5, %c0_6] : memref<3x8x128xf32, #tpu.memory_space<vmem>>, vector<1x8x128xf32>
    %5 = vector.shape_cast %4 : vector<1x8x128xf32> to vector<8x128xf32>
    %6 = arith.mulf %5, %3 : vector<8x128xf32>
    %c1 = arith.constant 1 : index
    %c0_7 = arith.constant 0 : index
    %c0_8 = arith.constant 0 : index
    %7 = vector.load %arg3[%c1, %c0_7, %c0_8] : memref<3x8x128xf32, #tpu.memory_space<vmem>>, vector<1x8x128xf32>
    %8 = vector.shape_cast %7 : vector<1x8x128xf32> to vector<8x128xf32>
    %9 = arith.mulf %8, %1 : vector<8x128xf32>
    %10 = arith.addf %6, %9 : vector<8x128xf32>
    %c127_i32 = arith.constant 127 : i32
    %11 = tpu.dynamic_rotate %1 by %c127_i32 dim 1 : vector<8x128xf32>, i32 -> vector<8x128xf32>
    %c2 = arith.constant 2 : index
    %c0_9 = arith.constant 0 : index
    %c0_10 = arith.constant 0 : index
    %12 = vector.load %arg3[%c2, %c0_9, %c0_10] : memref<3x8x128xf32, #tpu.memory_space<vmem>>, vector<1x8x128xf32>
    %13 = vector.shape_cast %12 : vector<1x8x128xf32> to vector<8x128xf32>
    %14 = arith.mulf %13, %11 : vector<8x128xf32>
    %15 = arith.addf %10, %14 : vector<8x128xf32>
    %c0_11 = arith.constant 0 : index
    %c0_12 = arith.constant 0 : index
    %16 = vector.load %arg4[%c0_11, %c0_12] : memref<8x1xf32, #tpu.memory_space<vmem>>, vector<8x1xf32>
    %17 = vector.broadcast %16 : vector<8x1xf32> to vector<8x128xf32>
    %18 = arith.addf %15, %17 : vector<8x128xf32>
    %cst = arith.constant dense<0.000000e+00> : vector<128xf32>
    %19 = vector.multi_reduction <add>, %18, %cst [0] : vector<8x128xf32> to vector<128xf32>
    %20 = vector.shape_cast %19 : vector<128xf32> to vector<1x128xf32>
    %c127_i32_13 = arith.constant 127 : i32
    %21 = tpu.dynamic_rotate %20 by %c127_i32_13 dim 1 : vector<1x128xf32>, i32 -> vector<1x128xf32>
    %c1_i32_14 = arith.constant 1 : i32
    %22 = tpu.dynamic_rotate %20 by %c1_i32_14 dim 1 : vector<1x128xf32>, i32 -> vector<1x128xf32>
    %23 = vector.extract_strided_slice %2 {offsets = [0, 0], sizes = [1, 128], strides = [1, 1]} : vector<4x128xf32> to vector<1x128xf32>
    %24 = arith.addf %20, %22 : vector<1x128xf32>
    %25 = arith.subf %21, %22 : vector<1x128xf32>
    %26 = arith.mulf %23, %25 : vector<1x128xf32>
    %27 = arith.addf %24, %26 : vector<1x128xf32>
    %c126_i32 = arith.constant 126 : i32
    %28 = tpu.dynamic_rotate %27 by %c126_i32 dim 1 : vector<1x128xf32>, i32 -> vector<1x128xf32>
    %c2_i32 = arith.constant 2 : i32
    %29 = tpu.dynamic_rotate %27 by %c2_i32 dim 1 : vector<1x128xf32>, i32 -> vector<1x128xf32>
    %30 = vector.extract_strided_slice %2 {offsets = [1, 0], sizes = [1, 128], strides = [1, 1]} : vector<4x128xf32> to vector<1x128xf32>
    %31 = arith.addf %27, %29 : vector<1x128xf32>
    %32 = arith.subf %28, %29 : vector<1x128xf32>
    %33 = arith.mulf %30, %32 : vector<1x128xf32>
    %34 = arith.addf %31, %33 : vector<1x128xf32>
    %c124_i32 = arith.constant 124 : i32
    %35 = tpu.dynamic_rotate %34 by %c124_i32 dim 1 : vector<1x128xf32>, i32 -> vector<1x128xf32>
    %c4_i32 = arith.constant 4 : i32
    %36 = tpu.dynamic_rotate %34 by %c4_i32 dim 1 : vector<1x128xf32>, i32 -> vector<1x128xf32>
    %37 = vector.extract_strided_slice %2 {offsets = [2, 0], sizes = [1, 128], strides = [1, 1]} : vector<4x128xf32> to vector<1x128xf32>
    %38 = arith.addf %34, %36 : vector<1x128xf32>
    %39 = arith.subf %35, %36 : vector<1x128xf32>
    %40 = arith.mulf %37, %39 : vector<1x128xf32>
    %41 = arith.addf %38, %40 : vector<1x128xf32>
    %c120_i32 = arith.constant 120 : i32
    %42 = tpu.dynamic_rotate %41 by %c120_i32 dim 1 : vector<1x128xf32>, i32 -> vector<1x128xf32>
    %c8_i32 = arith.constant 8 : i32
    %43 = tpu.dynamic_rotate %41 by %c8_i32 dim 1 : vector<1x128xf32>, i32 -> vector<1x128xf32>
    %44 = vector.extract_strided_slice %2 {offsets = [3, 0], sizes = [1, 128], strides = [1, 1]} : vector<4x128xf32> to vector<1x128xf32>
    %45 = arith.addf %41, %43 : vector<1x128xf32>
    %46 = arith.subf %42, %43 : vector<1x128xf32>
    %47 = arith.mulf %44, %46 : vector<1x128xf32>
    %48 = arith.addf %45, %47 : vector<1x128xf32>
    %cst_15 = arith.constant 1.562500e-02 : f32
    %49 = vector.broadcast %cst_15 : f32 to vector<1x128xf32>
    %50 = arith.mulf %48, %49 : vector<1x128xf32>
    %51 = vector.broadcast %50 : vector<1x128xf32> to vector<8x128xf32>
    %52 = arith.subf %18, %51 : vector<8x128xf32>
    %53 = arith.mulf %52, %52 : vector<8x128xf32>
    %c0_16 = arith.constant 0 : index
    %c0_17 = arith.constant 0 : index
    %54 = vector.load %arg7[%c0_16, %c0_17] : memref<8x1xf32, #tpu.memory_space<vmem>>, vector<8x1xf32>
    %55 = vector.broadcast %54 : vector<8x1xf32> to vector<8x128xf32>
    %56 = arith.mulf %53, %55 : vector<8x128xf32>
    %cst_18 = arith.constant dense<0.000000e+00> : vector<128xf32>
    %57 = vector.multi_reduction <add>, %56, %cst_18 [0] : vector<8x128xf32> to vector<128xf32>
    %58 = vector.shape_cast %57 : vector<128xf32> to vector<1x128xf32>
    %c127_i32_19 = arith.constant 127 : i32
    %59 = tpu.dynamic_rotate %58 by %c127_i32_19 dim 1 : vector<1x128xf32>, i32 -> vector<1x128xf32>
    %c1_i32_20 = arith.constant 1 : i32
    %60 = tpu.dynamic_rotate %58 by %c1_i32_20 dim 1 : vector<1x128xf32>, i32 -> vector<1x128xf32>
    %61 = vector.extract_strided_slice %2 {offsets = [0, 0], sizes = [1, 128], strides = [1, 1]} : vector<4x128xf32> to vector<1x128xf32>
    %62 = arith.addf %58, %60 : vector<1x128xf32>
    %63 = arith.subf %59, %60 : vector<1x128xf32>
    %64 = arith.mulf %61, %63 : vector<1x128xf32>
    %65 = arith.addf %62, %64 : vector<1x128xf32>
    %c126_i32_21 = arith.constant 126 : i32
    %66 = tpu.dynamic_rotate %65 by %c126_i32_21 dim 1 : vector<1x128xf32>, i32 -> vector<1x128xf32>
    %c2_i32_22 = arith.constant 2 : i32
    %67 = tpu.dynamic_rotate %65 by %c2_i32_22 dim 1 : vector<1x128xf32>, i32 -> vector<1x128xf32>
    %68 = vector.extract_strided_slice %2 {offsets = [1, 0], sizes = [1, 128], strides = [1, 1]} : vector<4x128xf32> to vector<1x128xf32>
    %69 = arith.addf %65, %67 : vector<1x128xf32>
    %70 = arith.subf %66, %67 : vector<1x128xf32>
    %71 = arith.mulf %68, %70 : vector<1x128xf32>
    %72 = arith.addf %69, %71 : vector<1x128xf32>
    %c124_i32_23 = arith.constant 124 : i32
    %73 = tpu.dynamic_rotate %72 by %c124_i32_23 dim 1 : vector<1x128xf32>, i32 -> vector<1x128xf32>
    %c4_i32_24 = arith.constant 4 : i32
    %74 = tpu.dynamic_rotate %72 by %c4_i32_24 dim 1 : vector<1x128xf32>, i32 -> vector<1x128xf32>
    %75 = vector.extract_strided_slice %2 {offsets = [2, 0], sizes = [1, 128], strides = [1, 1]} : vector<4x128xf32> to vector<1x128xf32>
    %76 = arith.addf %72, %74 : vector<1x128xf32>
    %77 = arith.subf %73, %74 : vector<1x128xf32>
    %78 = arith.mulf %75, %77 : vector<1x128xf32>
    %79 = arith.addf %76, %78 : vector<1x128xf32>
    %c120_i32_25 = arith.constant 120 : i32
    %80 = tpu.dynamic_rotate %79 by %c120_i32_25 dim 1 : vector<1x128xf32>, i32 -> vector<1x128xf32>
    %c8_i32_26 = arith.constant 8 : i32
    %81 = tpu.dynamic_rotate %79 by %c8_i32_26 dim 1 : vector<1x128xf32>, i32 -> vector<1x128xf32>
    %82 = vector.extract_strided_slice %2 {offsets = [3, 0], sizes = [1, 128], strides = [1, 1]} : vector<4x128xf32> to vector<1x128xf32>
    %83 = arith.addf %79, %81 : vector<1x128xf32>
    %84 = arith.subf %80, %81 : vector<1x128xf32>
    %85 = arith.mulf %82, %84 : vector<1x128xf32>
    %86 = arith.addf %83, %85 : vector<1x128xf32>
    %cst_27 = arith.constant 1.562500e-02 : f32
    %87 = vector.broadcast %cst_27 : f32 to vector<1x128xf32>
    %88 = arith.mulf %86, %87 : vector<1x128xf32>
    %cst_28 = arith.constant 9.99999974E-6 : f32
    %89 = vector.broadcast %cst_28 : f32 to vector<1x128xf32>
    %90 = arith.addf %88, %89 : vector<1x128xf32>
    %91 = math.rsqrt %90 : vector<1x128xf32>
    %92 = vector.broadcast %91 : vector<1x128xf32> to vector<8x128xf32>
    %93 = arith.mulf %52, %92 : vector<8x128xf32>
    %c0_29 = arith.constant 0 : index
    %c0_30 = arith.constant 0 : index
    %94 = vector.load %arg5[%c0_29, %c0_30] : memref<8x128xf32, #tpu.memory_space<vmem>>, vector<8x128xf32>
    %95 = arith.mulf %93, %94 : vector<8x128xf32>
    %c0_31 = arith.constant 0 : index
    %c0_32 = arith.constant 0 : index
    %96 = vector.load %arg6[%c0_31, %c0_32] : memref<8x128xf32, #tpu.memory_space<vmem>>, vector<8x128xf32>
    %97 = arith.addf %95, %96 : vector<8x128xf32>
    %c0_33 = arith.constant 0 : index
    %c0_34 = arith.constant 0 : index
    %98 = vector.load %arg8[%c0_33, %c0_34] : memref<8x8xf32, #tpu.memory_space<vmem>>, vector<8x8xf32>
    %99 = vector.extract_strided_slice %98 {offsets = [0, 0], sizes = [8, 1], strides = [1, 1]} : vector<8x8xf32> to vector<8x1xf32>
    %100 = vector.extract_strided_slice %97 {offsets = [0, 0], sizes = [1, 128], strides = [1, 1]} : vector<8x128xf32> to vector<1x128xf32>
    %101 = vector.broadcast %99 : vector<8x1xf32> to vector<8x128xf32>
    %102 = vector.broadcast %100 : vector<1x128xf32> to vector<8x128xf32>
    %103 = arith.mulf %101, %102 : vector<8x128xf32>
    %104 = vector.extract_strided_slice %98 {offsets = [0, 1], sizes = [8, 1], strides = [1, 1]} : vector<8x8xf32> to vector<8x1xf32>
    %105 = vector.extract_strided_slice %97 {offsets = [1, 0], sizes = [1, 128], strides = [1, 1]} : vector<8x128xf32> to vector<1x128xf32>
    %106 = vector.broadcast %104 : vector<8x1xf32> to vector<8x128xf32>
    %107 = vector.broadcast %105 : vector<1x128xf32> to vector<8x128xf32>
    %108 = arith.mulf %106, %107 : vector<8x128xf32>
    %109 = arith.addf %103, %108 : vector<8x128xf32>
    %110 = vector.extract_strided_slice %98 {offsets = [0, 2], sizes = [8, 1], strides = [1, 1]} : vector<8x8xf32> to vector<8x1xf32>
    %111 = vector.extract_strided_slice %97 {offsets = [2, 0], sizes = [1, 128], strides = [1, 1]} : vector<8x128xf32> to vector<1x128xf32>
    %112 = vector.broadcast %110 : vector<8x1xf32> to vector<8x128xf32>
    %113 = vector.broadcast %111 : vector<1x128xf32> to vector<8x128xf32>
    %114 = arith.mulf %112, %113 : vector<8x128xf32>
    %115 = arith.addf %109, %114 : vector<8x128xf32>
    %116 = vector.extract_strided_slice %98 {offsets = [0, 3], sizes = [8, 1], strides = [1, 1]} : vector<8x8xf32> to vector<8x1xf32>
    %117 = vector.extract_strided_slice %97 {offsets = [3, 0], sizes = [1, 128], strides = [1, 1]} : vector<8x128xf32> to vector<1x128xf32>
    %118 = vector.broadcast %116 : vector<8x1xf32> to vector<8x128xf32>
    %119 = vector.broadcast %117 : vector<1x128xf32> to vector<8x128xf32>
    %120 = arith.mulf %118, %119 : vector<8x128xf32>
    %121 = arith.addf %115, %120 : vector<8x128xf32>
    %122 = vector.extract_strided_slice %98 {offsets = [0, 4], sizes = [8, 1], strides = [1, 1]} : vector<8x8xf32> to vector<8x1xf32>
    %123 = vector.extract_strided_slice %97 {offsets = [4, 0], sizes = [1, 128], strides = [1, 1]} : vector<8x128xf32> to vector<1x128xf32>
    %124 = vector.broadcast %122 : vector<8x1xf32> to vector<8x128xf32>
    %125 = vector.broadcast %123 : vector<1x128xf32> to vector<8x128xf32>
    %126 = arith.mulf %124, %125 : vector<8x128xf32>
    %127 = arith.addf %121, %126 : vector<8x128xf32>
    %128 = vector.extract_strided_slice %98 {offsets = [0, 5], sizes = [8, 1], strides = [1, 1]} : vector<8x8xf32> to vector<8x1xf32>
    %129 = vector.extract_strided_slice %97 {offsets = [5, 0], sizes = [1, 128], strides = [1, 1]} : vector<8x128xf32> to vector<1x128xf32>
    %130 = vector.broadcast %128 : vector<8x1xf32> to vector<8x128xf32>
    %131 = vector.broadcast %129 : vector<1x128xf32> to vector<8x128xf32>
    %132 = arith.mulf %130, %131 : vector<8x128xf32>
    %133 = arith.addf %127, %132 : vector<8x128xf32>
    %134 = vector.extract_strided_slice %98 {offsets = [0, 6], sizes = [8, 1], strides = [1, 1]} : vector<8x8xf32> to vector<8x1xf32>
    %135 = vector.extract_strided_slice %97 {offsets = [6, 0], sizes = [1, 128], strides = [1, 1]} : vector<8x128xf32> to vector<1x128xf32>
    %136 = vector.broadcast %134 : vector<8x1xf32> to vector<8x128xf32>
    %137 = vector.broadcast %135 : vector<1x128xf32> to vector<8x128xf32>
    %138 = arith.mulf %136, %137 : vector<8x128xf32>
    %139 = arith.addf %133, %138 : vector<8x128xf32>
    %140 = vector.extract_strided_slice %98 {offsets = [0, 7], sizes = [8, 1], strides = [1, 1]} : vector<8x8xf32> to vector<8x1xf32>
    %141 = vector.extract_strided_slice %97 {offsets = [7, 0], sizes = [1, 128], strides = [1, 1]} : vector<8x128xf32> to vector<1x128xf32>
    %142 = vector.broadcast %140 : vector<8x1xf32> to vector<8x128xf32>
    %143 = vector.broadcast %141 : vector<1x128xf32> to vector<8x128xf32>
    %144 = arith.mulf %142, %143 : vector<8x128xf32>
    %145 = arith.addf %139, %144 : vector<8x128xf32>
    %c0_35 = arith.constant 0 : index
    %c0_36 = arith.constant 0 : index
    %146 = vector.load %arg9[%c0_35, %c0_36] : memref<8x1xf32, #tpu.memory_space<vmem>>, vector<8x1xf32>
    %147 = vector.broadcast %146 : vector<8x1xf32> to vector<8x128xf32>
    %148 = arith.addf %145, %147 : vector<8x128xf32>
    %cst_37 = arith.constant 0.707106769 : f32
    %149 = vector.broadcast %cst_37 : f32 to vector<8x128xf32>
    %150 = arith.mulf %148, %149 : vector<8x128xf32>
    %151 = math.absf %150 : vector<8x128xf32>
    %cst_38 = arith.constant 0.327591091 : f32
    %152 = vector.broadcast %cst_38 : f32 to vector<8x128xf32>
    %153 = arith.mulf %152, %151 : vector<8x128xf32>
    %cst_39 = arith.constant 1.000000e+00 : f32
    %154 = vector.broadcast %cst_39 : f32 to vector<8x128xf32>
    %155 = arith.addf %154, %153 : vector<8x128xf32>
    %cst_40 = arith.constant 1.000000e+00 : f32
    %156 = vector.broadcast %cst_40 : f32 to vector<8x128xf32>
    %157 = arith.divf %156, %155 : vector<8x128xf32>
    %cst_41 = arith.constant 1.06140542 : f32
    %158 = vector.broadcast %cst_41 : f32 to vector<8x128xf32>
    %159 = arith.mulf %158, %157 : vector<8x128xf32>
    %cst_42 = arith.constant 1.45315206 : f32
    %160 = vector.broadcast %cst_42 : f32 to vector<8x128xf32>
    %161 = arith.subf %159, %160 : vector<8x128xf32>
    %162 = arith.mulf %161, %157 : vector<8x128xf32>
    %cst_43 = arith.constant 1.42141378 : f32
    %163 = vector.broadcast %cst_43 : f32 to vector<8x128xf32>
    %164 = arith.addf %162, %163 : vector<8x128xf32>
    %165 = arith.mulf %164, %157 : vector<8x128xf32>
    %cst_44 = arith.constant 0.284496725 : f32
    %166 = vector.broadcast %cst_44 : f32 to vector<8x128xf32>
    %167 = arith.subf %165, %166 : vector<8x128xf32>
    %168 = arith.mulf %167, %157 : vector<8x128xf32>
    %cst_45 = arith.constant 0.254829586 : f32
    %169 = vector.broadcast %cst_45 : f32 to vector<8x128xf32>
    %170 = arith.addf %168, %169 : vector<8x128xf32>
    %171 = arith.mulf %170, %157 : vector<8x128xf32>
    %cst_46 = arith.constant 5.000000e-01 : f32
    %172 = vector.broadcast %cst_46 : f32 to vector<8x128xf32>
    %173 = arith.mulf %172, %171 : vector<8x128xf32>
    %cst_47 = arith.constant 0.000000e+00 : f32
    %174 = vector.broadcast %cst_47 : f32 to vector<8x128xf32>
    %175 = arith.subf %174, %151 : vector<8x128xf32>
    %176 = arith.mulf %175, %151 : vector<8x128xf32>
    %177 = math.exp %176 : vector<8x128xf32>
    %178 = arith.mulf %173, %177 : vector<8x128xf32>
    %cst_48 = arith.constant 0.000000e+00 : f32
    %179 = vector.broadcast %cst_48 : f32 to vector<8x128xf32>
    %180 = arith.cmpf oge, %150, %179 : vector<8x128xf32>
    %cst_49 = arith.constant 1.000000e+00 : f32
    %181 = vector.broadcast %cst_49 : f32 to vector<8x128xf32>
    %182 = arith.subf %181, %178 : vector<8x128xf32>
    %183 = arith.select %180, %182, %178 : vector<8x128xi1>, vector<8x128xf32>
    %184 = arith.mulf %148, %183 : vector<8x128xf32>
    %c1_i32_50 = arith.constant 1 : i32
    %185 = tpu.dynamic_rotate %184 by %c1_i32_50 dim 1 : vector<8x128xf32>, i32 -> vector<8x128xf32>
    %c0_51 = arith.constant 0 : index
    %c0_52 = arith.constant 0 : index
    %c0_53 = arith.constant 0 : index
    %186 = vector.load %arg10[%c0_51, %c0_52, %c0_53] : memref<3x8x128xf32, #tpu.memory_space<vmem>>, vector<1x8x128xf32>
    %187 = vector.shape_cast %186 : vector<1x8x128xf32> to vector<8x128xf32>
    %188 = arith.mulf %187, %185 : vector<8x128xf32>
    %c1_54 = arith.constant 1 : index
    %c0_55 = arith.constant 0 : index
    %c0_56 = arith.constant 0 : index
    %189 = vector.load %arg10[%c1_54, %c0_55, %c0_56] : memref<3x8x128xf32, #tpu.memory_space<vmem>>, vector<1x8x128xf32>
    %190 = vector.shape_cast %189 : vector<1x8x128xf32> to vector<8x128xf32>
    %191 = arith.mulf %190, %184 : vector<8x128xf32>
    %192 = arith.addf %188, %191 : vector<8x128xf32>
    %c127_i32_57 = arith.constant 127 : i32
    %193 = tpu.dynamic_rotate %184 by %c127_i32_57 dim 1 : vector<8x128xf32>, i32 -> vector<8x128xf32>
    %c2_58 = arith.constant 2 : index
    %c0_59 = arith.constant 0 : index
    %c0_60 = arith.constant 0 : index
    %194 = vector.load %arg10[%c2_58, %c0_59, %c0_60] : memref<3x8x128xf32, #tpu.memory_space<vmem>>, vector<1x8x128xf32>
    %195 = vector.shape_cast %194 : vector<1x8x128xf32> to vector<8x128xf32>
    %196 = arith.mulf %195, %193 : vector<8x128xf32>
    %197 = arith.addf %192, %196 : vector<8x128xf32>
    %c0_61 = arith.constant 0 : index
    %c0_62 = arith.constant 0 : index
    %198 = vector.load %arg11[%c0_61, %c0_62] : memref<8x1xf32, #tpu.memory_space<vmem>>, vector<8x1xf32>
    %199 = vector.broadcast %198 : vector<8x1xf32> to vector<8x128xf32>
    %200 = arith.addf %197, %199 : vector<8x128xf32>
    %cst_63 = arith.constant dense<0.000000e+00> : vector<128xf32>
    %201 = vector.multi_reduction <add>, %200, %cst_63 [0] : vector<8x128xf32> to vector<128xf32>
    %202 = vector.shape_cast %201 : vector<128xf32> to vector<1x128xf32>
    %c127_i32_64 = arith.constant 127 : i32
    %203 = tpu.dynamic_rotate %202 by %c127_i32_64 dim 1 : vector<1x128xf32>, i32 -> vector<1x128xf32>
    %c1_i32_65 = arith.constant 1 : i32
    %204 = tpu.dynamic_rotate %202 by %c1_i32_65 dim 1 : vector<1x128xf32>, i32 -> vector<1x128xf32>
    %205 = vector.extract_strided_slice %2 {offsets = [0, 0], sizes = [1, 128], strides = [1, 1]} : vector<4x128xf32> to vector<1x128xf32>
    %206 = arith.addf %202, %204 : vector<1x128xf32>
    %207 = arith.subf %203, %204 : vector<1x128xf32>
    %208 = arith.mulf %205, %207 : vector<1x128xf32>
    %209 = arith.addf %206, %208 : vector<1x128xf32>
    %c126_i32_66 = arith.constant 126 : i32
    %210 = tpu.dynamic_rotate %209 by %c126_i32_66 dim 1 : vector<1x128xf32>, i32 -> vector<1x128xf32>
    %c2_i32_67 = arith.constant 2 : i32
    %211 = tpu.dynamic_rotate %209 by %c2_i32_67 dim 1 : vector<1x128xf32>, i32 -> vector<1x128xf32>
    %212 = vector.extract_strided_slice %2 {offsets = [1, 0], sizes = [1, 128], strides = [1, 1]} : vector<4x128xf32> to vector<1x128xf32>
    %213 = arith.addf %209, %211 : vector<1x128xf32>
    %214 = arith.subf %210, %211 : vector<1x128xf32>
    %215 = arith.mulf %212, %214 : vector<1x128xf32>
    %216 = arith.addf %213, %215 : vector<1x128xf32>
    %c124_i32_68 = arith.constant 124 : i32
    %217 = tpu.dynamic_rotate %216 by %c124_i32_68 dim 1 : vector<1x128xf32>, i32 -> vector<1x128xf32>
    %c4_i32_69 = arith.constant 4 : i32
    %218 = tpu.dynamic_rotate %216 by %c4_i32_69 dim 1 : vector<1x128xf32>, i32 -> vector<1x128xf32>
    %219 = vector.extract_strided_slice %2 {offsets = [2, 0], sizes = [1, 128], strides = [1, 1]} : vector<4x128xf32> to vector<1x128xf32>
    %220 = arith.addf %216, %218 : vector<1x128xf32>
    %221 = arith.subf %217, %218 : vector<1x128xf32>
    %222 = arith.mulf %219, %221 : vector<1x128xf32>
    %223 = arith.addf %220, %222 : vector<1x128xf32>
    %c120_i32_70 = arith.constant 120 : i32
    %224 = tpu.dynamic_rotate %223 by %c120_i32_70 dim 1 : vector<1x128xf32>, i32 -> vector<1x128xf32>
    %c8_i32_71 = arith.constant 8 : i32
    %225 = tpu.dynamic_rotate %223 by %c8_i32_71 dim 1 : vector<1x128xf32>, i32 -> vector<1x128xf32>
    %226 = vector.extract_strided_slice %2 {offsets = [3, 0], sizes = [1, 128], strides = [1, 1]} : vector<4x128xf32> to vector<1x128xf32>
    %227 = arith.addf %223, %225 : vector<1x128xf32>
    %228 = arith.subf %224, %225 : vector<1x128xf32>
    %229 = arith.mulf %226, %228 : vector<1x128xf32>
    %230 = arith.addf %227, %229 : vector<1x128xf32>
    %cst_72 = arith.constant 7.812500e-03 : f32
    %231 = vector.broadcast %cst_72 : f32 to vector<1x128xf32>
    %232 = arith.mulf %230, %231 : vector<1x128xf32>
    %233 = vector.broadcast %232 : vector<1x128xf32> to vector<8x128xf32>
    %234 = arith.subf %200, %233 : vector<8x128xf32>
    %235 = arith.mulf %234, %234 : vector<8x128xf32>
    %cst_73 = arith.constant dense<0.000000e+00> : vector<128xf32>
    %236 = vector.multi_reduction <add>, %235, %cst_73 [0] : vector<8x128xf32> to vector<128xf32>
    %237 = vector.shape_cast %236 : vector<128xf32> to vector<1x128xf32>
    %c127_i32_74 = arith.constant 127 : i32
    %238 = tpu.dynamic_rotate %237 by %c127_i32_74 dim 1 : vector<1x128xf32>, i32 -> vector<1x128xf32>
    %c1_i32_75 = arith.constant 1 : i32
    %239 = tpu.dynamic_rotate %237 by %c1_i32_75 dim 1 : vector<1x128xf32>, i32 -> vector<1x128xf32>
    %240 = vector.extract_strided_slice %2 {offsets = [0, 0], sizes = [1, 128], strides = [1, 1]} : vector<4x128xf32> to vector<1x128xf32>
    %241 = arith.addf %237, %239 : vector<1x128xf32>
    %242 = arith.subf %238, %239 : vector<1x128xf32>
    %243 = arith.mulf %240, %242 : vector<1x128xf32>
    %244 = arith.addf %241, %243 : vector<1x128xf32>
    %c126_i32_76 = arith.constant 126 : i32
    %245 = tpu.dynamic_rotate %244 by %c126_i32_76 dim 1 : vector<1x128xf32>, i32 -> vector<1x128xf32>
    %c2_i32_77 = arith.constant 2 : i32
    %246 = tpu.dynamic_rotate %244 by %c2_i32_77 dim 1 : vector<1x128xf32>, i32 -> vector<1x128xf32>
    %247 = vector.extract_strided_slice %2 {offsets = [1, 0], sizes = [1, 128], strides = [1, 1]} : vector<4x128xf32> to vector<1x128xf32>
    %248 = arith.addf %244, %246 : vector<1x128xf32>
    %249 = arith.subf %245, %246 : vector<1x128xf32>
    %250 = arith.mulf %247, %249 : vector<1x128xf32>
    %251 = arith.addf %248, %250 : vector<1x128xf32>
    %c124_i32_78 = arith.constant 124 : i32
    %252 = tpu.dynamic_rotate %251 by %c124_i32_78 dim 1 : vector<1x128xf32>, i32 -> vector<1x128xf32>
    %c4_i32_79 = arith.constant 4 : i32
    %253 = tpu.dynamic_rotate %251 by %c4_i32_79 dim 1 : vector<1x128xf32>, i32 -> vector<1x128xf32>
    %254 = vector.extract_strided_slice %2 {offsets = [2, 0], sizes = [1, 128], strides = [1, 1]} : vector<4x128xf32> to vector<1x128xf32>
    %255 = arith.addf %251, %253 : vector<1x128xf32>
    %256 = arith.subf %252, %253 : vector<1x128xf32>
    %257 = arith.mulf %254, %256 : vector<1x128xf32>
    %258 = arith.addf %255, %257 : vector<1x128xf32>
    %c120_i32_80 = arith.constant 120 : i32
    %259 = tpu.dynamic_rotate %258 by %c120_i32_80 dim 1 : vector<1x128xf32>, i32 -> vector<1x128xf32>
    %c8_i32_81 = arith.constant 8 : i32
    %260 = tpu.dynamic_rotate %258 by %c8_i32_81 dim 1 : vector<1x128xf32>, i32 -> vector<1x128xf32>
    %261 = vector.extract_strided_slice %2 {offsets = [3, 0], sizes = [1, 128], strides = [1, 1]} : vector<4x128xf32> to vector<1x128xf32>
    %262 = arith.addf %258, %260 : vector<1x128xf32>
    %263 = arith.subf %259, %260 : vector<1x128xf32>
    %264 = arith.mulf %261, %263 : vector<1x128xf32>
    %265 = arith.addf %262, %264 : vector<1x128xf32>
    %cst_82 = arith.constant 7.812500e-03 : f32
    %266 = vector.broadcast %cst_82 : f32 to vector<1x128xf32>
    %267 = arith.mulf %265, %266 : vector<1x128xf32>
    %cst_83 = arith.constant 9.99999974E-6 : f32
    %268 = vector.broadcast %cst_83 : f32 to vector<1x128xf32>
    %269 = arith.addf %267, %268 : vector<1x128xf32>
    %270 = math.rsqrt %269 : vector<1x128xf32>
    %271 = vector.broadcast %270 : vector<1x128xf32> to vector<8x128xf32>
    %272 = arith.mulf %234, %271 : vector<8x128xf32>
    %c0_84 = arith.constant 0 : index
    %c0_85 = arith.constant 0 : index
    %273 = vector.load %arg12[%c0_84, %c0_85] : memref<8x128xf32, #tpu.memory_space<vmem>>, vector<8x128xf32>
    %274 = arith.mulf %272, %273 : vector<8x128xf32>
    %c0_86 = arith.constant 0 : index
    %c0_87 = arith.constant 0 : index
    %275 = vector.load %arg13[%c0_86, %c0_87] : memref<8x128xf32, #tpu.memory_space<vmem>>, vector<8x128xf32>
    %276 = arith.addf %274, %275 : vector<8x128xf32>
    %c0_88 = arith.constant 0 : index
    %c0_89 = arith.constant 0 : index
    %277 = vector.load %arg15[%c0_88, %c0_89] : memref<8x8xf32, #tpu.memory_space<vmem>>, vector<8x8xf32>
    %278 = vector.extract_strided_slice %277 {offsets = [0, 0], sizes = [8, 1], strides = [1, 1]} : vector<8x8xf32> to vector<8x1xf32>
    %279 = vector.extract_strided_slice %276 {offsets = [0, 0], sizes = [1, 128], strides = [1, 1]} : vector<8x128xf32> to vector<1x128xf32>
    %280 = vector.broadcast %278 : vector<8x1xf32> to vector<8x128xf32>
    %281 = vector.broadcast %279 : vector<1x128xf32> to vector<8x128xf32>
    %282 = arith.mulf %280, %281 : vector<8x128xf32>
    %283 = vector.extract_strided_slice %277 {offsets = [0, 1], sizes = [8, 1], strides = [1, 1]} : vector<8x8xf32> to vector<8x1xf32>
    %284 = vector.extract_strided_slice %276 {offsets = [1, 0], sizes = [1, 128], strides = [1, 1]} : vector<8x128xf32> to vector<1x128xf32>
    %285 = vector.broadcast %283 : vector<8x1xf32> to vector<8x128xf32>
    %286 = vector.broadcast %284 : vector<1x128xf32> to vector<8x128xf32>
    %287 = arith.mulf %285, %286 : vector<8x128xf32>
    %288 = arith.addf %282, %287 : vector<8x128xf32>
    %289 = vector.extract_strided_slice %277 {offsets = [0, 2], sizes = [8, 1], strides = [1, 1]} : vector<8x8xf32> to vector<8x1xf32>
    %290 = vector.extract_strided_slice %276 {offsets = [2, 0], sizes = [1, 128], strides = [1, 1]} : vector<8x128xf32> to vector<1x128xf32>
    %291 = vector.broadcast %289 : vector<8x1xf32> to vector<8x128xf32>
    %292 = vector.broadcast %290 : vector<1x128xf32> to vector<8x128xf32>
    %293 = arith.mulf %291, %292 : vector<8x128xf32>
    %294 = arith.addf %288, %293 : vector<8x128xf32>
    %295 = vector.extract_strided_slice %277 {offsets = [0, 3], sizes = [8, 1], strides = [1, 1]} : vector<8x8xf32> to vector<8x1xf32>
    %296 = vector.extract_strided_slice %276 {offsets = [3, 0], sizes = [1, 128], strides = [1, 1]} : vector<8x128xf32> to vector<1x128xf32>
    %297 = vector.broadcast %295 : vector<8x1xf32> to vector<8x128xf32>
    %298 = vector.broadcast %296 : vector<1x128xf32> to vector<8x128xf32>
    %299 = arith.mulf %297, %298 : vector<8x128xf32>
    %300 = arith.addf %294, %299 : vector<8x128xf32>
    %301 = vector.extract_strided_slice %277 {offsets = [0, 4], sizes = [8, 1], strides = [1, 1]} : vector<8x8xf32> to vector<8x1xf32>
    %302 = vector.extract_strided_slice %276 {offsets = [4, 0], sizes = [1, 128], strides = [1, 1]} : vector<8x128xf32> to vector<1x128xf32>
    %303 = vector.broadcast %301 : vector<8x1xf32> to vector<8x128xf32>
    %304 = vector.broadcast %302 : vector<1x128xf32> to vector<8x128xf32>
    %305 = arith.mulf %303, %304 : vector<8x128xf32>
    %306 = arith.addf %300, %305 : vector<8x128xf32>
    %307 = vector.extract_strided_slice %277 {offsets = [0, 5], sizes = [8, 1], strides = [1, 1]} : vector<8x8xf32> to vector<8x1xf32>
    %308 = vector.extract_strided_slice %276 {offsets = [5, 0], sizes = [1, 128], strides = [1, 1]} : vector<8x128xf32> to vector<1x128xf32>
    %309 = vector.broadcast %307 : vector<8x1xf32> to vector<8x128xf32>
    %310 = vector.broadcast %308 : vector<1x128xf32> to vector<8x128xf32>
    %311 = arith.mulf %309, %310 : vector<8x128xf32>
    %312 = arith.addf %306, %311 : vector<8x128xf32>
    %313 = vector.extract_strided_slice %277 {offsets = [0, 6], sizes = [8, 1], strides = [1, 1]} : vector<8x8xf32> to vector<8x1xf32>
    %314 = vector.extract_strided_slice %276 {offsets = [6, 0], sizes = [1, 128], strides = [1, 1]} : vector<8x128xf32> to vector<1x128xf32>
    %315 = vector.broadcast %313 : vector<8x1xf32> to vector<8x128xf32>
    %316 = vector.broadcast %314 : vector<1x128xf32> to vector<8x128xf32>
    %317 = arith.mulf %315, %316 : vector<8x128xf32>
    %318 = arith.addf %312, %317 : vector<8x128xf32>
    %319 = vector.extract_strided_slice %277 {offsets = [0, 7], sizes = [8, 1], strides = [1, 1]} : vector<8x8xf32> to vector<8x1xf32>
    %320 = vector.extract_strided_slice %276 {offsets = [7, 0], sizes = [1, 128], strides = [1, 1]} : vector<8x128xf32> to vector<1x128xf32>
    %321 = vector.broadcast %319 : vector<8x1xf32> to vector<8x128xf32>
    %322 = vector.broadcast %320 : vector<1x128xf32> to vector<8x128xf32>
    %323 = arith.mulf %321, %322 : vector<8x128xf32>
    %324 = arith.addf %318, %323 : vector<8x128xf32>
    %c0_90 = arith.constant 0 : index
    %c0_91 = arith.constant 0 : index
    %325 = vector.load %arg16[%c0_90, %c0_91] : memref<8x1xf32, #tpu.memory_space<vmem>>, vector<8x1xf32>
    %326 = vector.broadcast %325 : vector<8x1xf32> to vector<8x128xf32>
    %327 = arith.addf %324, %326 : vector<8x128xf32>
    %cst_92 = arith.constant 0.707106769 : f32
    %328 = vector.broadcast %cst_92 : f32 to vector<8x128xf32>
    %329 = arith.mulf %327, %328 : vector<8x128xf32>
    %330 = math.absf %329 : vector<8x128xf32>
    %cst_93 = arith.constant 0.327591091 : f32
    %331 = vector.broadcast %cst_93 : f32 to vector<8x128xf32>
    %332 = arith.mulf %331, %330 : vector<8x128xf32>
    %cst_94 = arith.constant 1.000000e+00 : f32
    %333 = vector.broadcast %cst_94 : f32 to vector<8x128xf32>
    %334 = arith.addf %333, %332 : vector<8x128xf32>
    %cst_95 = arith.constant 1.000000e+00 : f32
    %335 = vector.broadcast %cst_95 : f32 to vector<8x128xf32>
    %336 = arith.divf %335, %334 : vector<8x128xf32>
    %cst_96 = arith.constant 1.06140542 : f32
    %337 = vector.broadcast %cst_96 : f32 to vector<8x128xf32>
    %338 = arith.mulf %337, %336 : vector<8x128xf32>
    %cst_97 = arith.constant 1.45315206 : f32
    %339 = vector.broadcast %cst_97 : f32 to vector<8x128xf32>
    %340 = arith.subf %338, %339 : vector<8x128xf32>
    %341 = arith.mulf %340, %336 : vector<8x128xf32>
    %cst_98 = arith.constant 1.42141378 : f32
    %342 = vector.broadcast %cst_98 : f32 to vector<8x128xf32>
    %343 = arith.addf %341, %342 : vector<8x128xf32>
    %344 = arith.mulf %343, %336 : vector<8x128xf32>
    %cst_99 = arith.constant 0.284496725 : f32
    %345 = vector.broadcast %cst_99 : f32 to vector<8x128xf32>
    %346 = arith.subf %344, %345 : vector<8x128xf32>
    %347 = arith.mulf %346, %336 : vector<8x128xf32>
    %cst_100 = arith.constant 0.254829586 : f32
    %348 = vector.broadcast %cst_100 : f32 to vector<8x128xf32>
    %349 = arith.addf %347, %348 : vector<8x128xf32>
    %350 = arith.mulf %349, %336 : vector<8x128xf32>
    %cst_101 = arith.constant 5.000000e-01 : f32
    %351 = vector.broadcast %cst_101 : f32 to vector<8x128xf32>
    %352 = arith.mulf %351, %350 : vector<8x128xf32>
    %cst_102 = arith.constant 0.000000e+00 : f32
    %353 = vector.broadcast %cst_102 : f32 to vector<8x128xf32>
    %354 = arith.subf %353, %330 : vector<8x128xf32>
    %355 = arith.mulf %354, %330 : vector<8x128xf32>
    %356 = math.exp %355 : vector<8x128xf32>
    %357 = arith.mulf %352, %356 : vector<8x128xf32>
    %cst_103 = arith.constant 0.000000e+00 : f32
    %358 = vector.broadcast %cst_103 : f32 to vector<8x128xf32>
    %359 = arith.cmpf oge, %329, %358 : vector<8x128xf32>
    %cst_104 = arith.constant 1.000000e+00 : f32
    %360 = vector.broadcast %cst_104 : f32 to vector<8x128xf32>
    %361 = arith.subf %360, %357 : vector<8x128xf32>
    %362 = arith.select %359, %361, %357 : vector<8x128xi1>, vector<8x128xf32>
    %363 = arith.mulf %327, %362 : vector<8x128xf32>
    %364 = arith.addf %1, %363 : vector<8x128xf32>
    %c0_105 = arith.constant 0 : index
    %c0_106 = arith.constant 0 : index
    %c0_107 = arith.constant 0 : index
    %365 = vector.load %arg17[%c0_105, %c0_106, %c0_107] : memref<1x8x128xf32, #tpu.memory_space<vmem>>, vector<1x8x128xf32>
    %366 = vector.shape_cast %365 : vector<1x8x128xf32> to vector<8x128xf32>
    %367 = vector.shape_cast %364 : vector<8x128xf32> to vector<1x8x128xf32>
    tpu.vector_store %arg17[%c0_105, %c0_106, %c0_107], %367 {strides = array<i32>} : memref<1x8x128xf32, #tpu.memory_space<vmem>>, vector<1x8x128xf32>,
    return
  }
  func.func @transform_0(%arg0: i32) -> (i32, i32, i32) {
    %c0_i32 = arith.constant 0 : i32
    %c0_i32_0 = arith.constant 0 : i32
    %c0_i32_1 = arith.constant 0 : i32
    return %arg0, %c0_i32, %c0_i32_0 : i32, i32, i32
  }
  func.func @transform_1(%arg0: i32) -> (i32, i32) {
    %c0_i32 = arith.constant 0 : i32
    %c0_i32_0 = arith.constant 0 : i32
    %c0_i32_1 = arith.constant 0 : i32
    return %c0_i32, %c0_i32_0 : i32, i32
  }
  func.func @transform_2(%arg0: i32) -> (i32, i32, i32) {
    %c0_i32 = arith.constant 0 : i32
    %c0_i32_0 = arith.constant 0 : i32
    %c0_i32_1 = arith.constant 0 : i32
    %c0_i32_2 = arith.constant 0 : i32
    return %c0_i32, %c0_i32_0, %c0_i32_1 : i32, i32, i32
  }
  func.func @transform_3(%arg0: i32) -> (i32, i32) {
    %c0_i32 = arith.constant 0 : i32
    %c0_i32_0 = arith.constant 0 : i32
    %c0_i32_1 = arith.constant 0 : i32
    return %c0_i32, %c0_i32_0 : i32, i32
  }
  func.func @transform_4(%arg0: i32) -> (i32, i32) {
    %c0_i32 = arith.constant 0 : i32
    %c0_i32_0 = arith.constant 0 : i32
    %c0_i32_1 = arith.constant 0 : i32
    return %c0_i32, %c0_i32_0 : i32, i32
  }
  func.func @transform_5(%arg0: i32) -> (i32, i32) {
    %c0_i32 = arith.constant 0 : i32
    %c0_i32_0 = arith.constant 0 : i32
    %c0_i32_1 = arith.constant 0 : i32
    return %c0_i32, %c0_i32_0 : i32, i32
  }
  func.func @transform_6(%arg0: i32) -> (i32, i32) {
    %c0_i32 = arith.constant 0 : i32
    %c0_i32_0 = arith.constant 0 : i32
    %c0_i32_1 = arith.constant 0 : i32
    return %c0_i32, %c0_i32_0 : i32, i32
  }
  func.func @transform_7(%arg0: i32) -> (i32, i32) {
    %c0_i32 = arith.constant 0 : i32
    %c0_i32_0 = arith.constant 0 : i32
    %c0_i32_1 = arith.constant 0 : i32
    return %c0_i32, %c0_i32_0 : i32, i32
  }
  func.func @transform_8(%arg0: i32) -> (i32, i32) {
    %c0_i32 = arith.constant 0 : i32
    %c0_i32_0 = arith.constant 0 : i32
    %c0_i32_1 = arith.constant 0 : i32
    return %c0_i32, %c0_i32_0 : i32, i32
  }
  func.func @transform_9(%arg0: i32) -> (i32, i32, i32) {
    %c0_i32 = arith.constant 0 : i32
    %c0_i32_0 = arith.constant 0 : i32
    %c0_i32_1 = arith.constant 0 : i32
    %c0_i32_2 = arith.constant 0 : i32
    return %c0_i32, %c0_i32_0, %c0_i32_1 : i32, i32, i32
  }
  func.func @transform_10(%arg0: i32) -> (i32, i32) {
    %c0_i32 = arith.constant 0 : i32
    %c0_i32_0 = arith.constant 0 : i32
    %c0_i32_1 = arith.constant 0 : i32
    return %c0_i32, %c0_i32_0 : i32, i32
  }
  func.func @transform_11(%arg0: i32) -> (i32, i32) {
    %c0_i32 = arith.constant 0 : i32
    %c0_i32_0 = arith.constant 0 : i32
    %c0_i32_1 = arith.constant 0 : i32
    return %c0_i32, %c0_i32_0 : i32, i32
  }
  func.func @transform_12(%arg0: i32) -> (i32, i32) {
    %c0_i32 = arith.constant 0 : i32
    %c0_i32_0 = arith.constant 0 : i32
    %c0_i32_1 = arith.constant 0 : i32
    return %c0_i32, %c0_i32_0 : i32, i32
  }
  func.func @transform_13(%arg0: i32) -> (i32, i32) {
    %c0_i32 = arith.constant 0 : i32
    %c0_i32_0 = arith.constant 0 : i32
    %c0_i32_1 = arith.constant 0 : i32
    return %c0_i32, %c0_i32_0 : i32, i32
  }
  func.func @transform_14(%arg0: i32) -> (i32, i32) {
    %c0_i32 = arith.constant 0 : i32
    %c0_i32_0 = arith.constant 0 : i32
    %c0_i32_1 = arith.constant 0 : i32
    return %c0_i32, %c0_i32_0 : i32, i32
  }
  func.func @transform_15(%arg0: i32) -> (i32, i32) {
    %c0_i32 = arith.constant 0 : i32
    %c0_i32_0 = arith.constant 0 : i32
    %c0_i32_1 = arith.constant 0 : i32
    return %c0_i32, %c0_i32_0 : i32, i32
  }
  func.func @transform_16(%arg0: i32) -> (i32, i32, i32) {
    %c0_i32 = arith.constant 0 : i32
    %c0_i32_0 = arith.constant 0 : i32
    %c0_i32_1 = arith.constant 0 : i32
    return %arg0, %c0_i32, %c0_i32_0 : i32, i32, i32
  }
}

</mosaic_0001>

<bundles_post_ra>
// kernel: tile.24
= control target key start
LH: loop header
LB: loop body
LE: loop exit
PB: predicated region body
PF: predicated region fallthrough
CT: control target
= control target key end

     0   :  { %vm4_vm0 = vcmask 1047556   ;;  %s99_s14 = smov 112   ;;  %s100_s19 = smov 80   ;;  %vm6_vm1 = vcmask 130048   ;;  %vm16_vm2 = vcmask 1048448   ;;  %vm26_vm3 = vcmask 917248   ;;  %s196_s0 = inlined_call_operand.vmem [shape: f32[8,8,16], index: 0, kind: input, shape index: {}]   ;;  %s197_s1 = inlined_call_operand.vmem [shape: f32[8,128], index: 1, kind: output, shape index: {}]  }
   0x1   :  { %v78_v0 = vld [vmem:[%s196_s0 + $0x7] ss:$8 sm:$0xf]   ;;  %v82_v3 = vld [vmem:[%s196_s0 + $0x5] ss:$8 sm:$0xf]  }
   0x2   :  { %v79_v1 = vld [vmem:[%s196_s0 + $0x7] ss:$8 sm:$0xf0]   ;;  %v83_v4 = vld [vmem:[%s196_s0 + $0x5] ss:$8 sm:$0xf0]  }
   0x3   :  { %v13_v2 = vsel %vm4_vm0, %v79_v1, %v78_v0  ;;  %v33_v5 = vsel %vm4_vm0, %v83_v4, %v82_v3  ;;  %v80_v6 = vld [vmem:[%s196_s0 + $0x6] ss:$8 sm:$0xf]   ;;  %v84_v9 = vld [vmem:[%s196_s0 + $0x4] ss:$8 sm:$0xf]  }
   0x4   :  { %14 = vrot.lane.b32.xlu0 %v13_v2, %s99_s14  ;;  %v81_v7 = vld [vmem:[%s196_s0 + $0x6] ss:$8 sm:$0xf0]   ;;  %34 = vrot.lane.b32.xlu1 %v33_v5, %s100_s19  ;;  %v85_v10 = vld [vmem:[%s196_s0 + $0x4] ss:$8 sm:$0xf0]  }
   0x5   :  { %v23_v8 = vsel %vm4_vm0, %v81_v7, %v80_v6  ;;  %v86_v11 = vld [vmem:[%s196_s0 + $0x3] ss:$8 sm:$0xf]   ;;  %v43_v12 = vsel %vm4_vm0, %v85_v10, %v84_v9  ;;  %s101_s28 = smov 96   ;;  %s102_s4 = smov 64   ;;  %vm36_vm4 = vcmask 786048  }
   0x6   :  { %v87_v13 = vld [vmem:[%s196_s0 + $0x3] ss:$8 sm:$0xf0]   ;;  %v88_v14 = vld [vmem:[%s196_s0 + $0x2] ss:$8 sm:$0xf]  }
   0x7   :  { %v89_v15 = vld [vmem:[%s196_s0 + $0x2] ss:$8 sm:$0xf0]   ;;  %v53_v16 = vsel %vm4_vm0, %v87_v13, %v86_v11  ;;  %v90_v17 = vld [vmem:[%s196_s0 + $0x1] ss:$8 sm:$0xf]  }
   0x8   :  { %24 = vrot.lane.b32.xlu0 %v23_v8, %s101_s28  ;;  %44 = vrot.lane.b32.xlu1 %v43_v12, %s102_s4  ;;  %v63_v18 = vsel %vm4_vm0, %v89_v15, %v88_v14  ;;  %v91_v19 = vld [vmem:[%s196_s0 + $0x1] ss:$8 sm:$0xf0]   ;;  %v2_v20 = vld [vmem:[%s196_s0] ss:$8 sm:$0xf]  }
   0x9   :  { %v3_v21 = vld [vmem:[%s196_s0] ss:$8 sm:$0xf0]   ;;  %s103_s0 = smov 48   ;;  %s104_s13 = smov 32   ;;  %v73_v23 = vsel %vm4_vm0, %v91_v19, %v90_v17  ;;  %vm46_vm5 = vcmask 654848  }
   0xa   :  { %v5_v22 = vsel %vm4_vm0, %v3_v21, %v2_v20  ;;  %s105_s16 = smov 16   ;;  %vm56_vm6 = vcmask 523648   ;;  %vm66_vm7 = vcmask 392448   ;;  %vm76_vm8 = vcmask 261248  }
   0xb   :  { %7 = vst.msk [vmem:[%s197_s1] sm:$0xff] %vm6_vm1, %v5_v22  }
   0xc   :  { %54 = vrot.lane.b32.xlu0 %v53_v16, %s103_s0  ;;  %64 = vrot.lane.b32.xlu1 %v63_v18, %s104_s13 }
  0x10   :  { %74 = vrot.lane.b32.xlu0 %v73_v23, %s105_s16 }
  0x76   :  { %v15_v24 = vpop.permute.xlu0 %14   ;;  %v35_v25 = vpop.permute.xlu1 %34  }
  0x77   :  { %17 = vst.msk [vmem:[%s197_s1] sm:$0xff] %vm16_vm2, %v15_v24  }
  0x7a   :  { %v25_v26 = vpop.permute.xlu0 %24   ;;  %v45_v27 = vpop.permute.xlu1 %44  }
  0x7b   :  { %27 = vst.msk [vmem:[%s197_s1] sm:$0xff] %vm26_vm3, %v25_v26  }
  0x7c   :  { %37 = vst.msk [vmem:[%s197_s1] sm:$0xff] %vm36_vm4, %v35_v25  }
  0x7d   :  { %47 = vst.msk [vmem:[%s197_s1] sm:$0xff] %vm46_vm5, %v45_v27  }
  0x7e   :  { %v55_v28 = vpop.permute.xlu0 %54   ;;  %v65_v29 = vpop.permute.xlu1 %64  }
  0x7f   :  { %57 = vst.msk [vmem:[%s197_s1] sm:$0xff] %vm56_vm6, %v55_v28  }
  0x80   :  { %67 = vst.msk [vmem:[%s197_s1] sm:$0xff] %vm66_vm7, %v65_v29  }
  0x82   :  { %v75_v30 = vpop.permute.xlu0 %74  }
  0x83   :  { %77 = vst.msk [vmem:[%s197_s1] sm:$0xff] %vm76_vm8, %v75_v30  }

// kernel: resblock_forward.1
= control target key start
LH: loop header
LB: loop body
LE: loop exit
PB: predicated region body
PF: predicated region fallthrough
CT: control target
= control target key end

     0   :  { %v654_v0 = vmov 0   ;;  %s655_s24 = smov 127   ;;  %s656_s25 = smov 1   ;;  %v133_v48 = vlaneseq  ;;  %s949_s3 = inlined_call_operand.vmem [shape: f32[8,1], index: 3, kind: input, shape index: {}]   ;;  %s950_s0 = inlined_call_operand.vmem [shape: f32[1,8,128], index: 0, kind: input, shape index: {}]   ;;  %s951_s13 = inlined_call_operand.vmem [shape: f32[8,1], index: 13, kind: input, shape index: {}]   ;;  %s952_s2 = inlined_call_operand.vmem [shape: f32[3,8,128], index: 2, kind: input, shape index: {}]   ;;  %s953_s1 = inlined_call_operand.vmem [shape: f32[4,128], index: 1, kind: input, shape index: {}]   ;;  %s954_s6 = inlined_call_operand.vmem [shape: f32[8,1], index: 6, kind: input, shape index: {}]   ;;  %s955_s7 = inlined_call_operand.vmem [shape: f32[8,8], index: 7, kind: input, shape index: {}]   ;;  %s956_s8 = inlined_call_operand.vmem [shape: f32[8,1], index: 8, kind: input, shape index: {}]   ;;  %s957_s10 = inlined_call_operand.vmem [shape: f32[8,1], index: 10, kind: input, shape index: {}]   ;;  %s958_s4 = inlined_call_operand.vmem [shape: f32[8,128], index: 4, kind: input, shape index: {}]   ;;  %s959_s5 = inlined_call_operand.vmem [shape: f32[8,128], index: 5, kind: input, shape index: {}]   ;;  %s960_s9 = inlined_call_operand.vmem [shape: f32[3,8,128], index: 9, kind: input, shape index: {}]   ;;  %s961_s14 = inlined_call_operand.vmem [shape: f32[8,8], index: 14, kind: input, shape index: {}]   ;;  %s962_s15 = inlined_call_operand.vmem [shape: f32[8,1], index: 15, kind: input, shape index: {}]   ;;  %s963_s11 = inlined_call_operand.vmem [shape: f32[8,128], index: 11, kind: input, shape index: {}]   ;;  %s964_s12 = inlined_call_operand.vmem [shape: f32[8,128], index: 12, kind: input, shape index: {}]   ;;  %s965_s16 = inlined_call_operand.vmem [shape: f32[1,8,128], index: 16, kind: output, shape index: {}]  }
   0x1   :  { %966 = sst [smem:[#allocation2_spill]] %s949_s3  ;;  %622 = vset.pattern.permute.xlu0 %v654_v0  ;;  %v762_v2 = vld [vmem:[%s950_s0] sm:$0xff]  ;;  %623 = vset.pattern.permute.xlu1 %v654_v0  ;;  %v598_v4 = vld [vmem:[%s952_s2 + $0x8] sm:$0xff]  ;;  %v599_v6 = vld [vmem:[%s952_s2 + $0x10] sm:$0xff]  ;;  %s657_s17 = smov 2  }
   0x2   :  { %s967_s21 = sld [smem:[#allocation2_spill]]  ;;  %63 = vrot.lane.b32.xlu1 %v762_v2, %s655_s24  ;;  %v57_v5 = vld [vmem:[%s952_s2] sm:$0xff]  ;;  %v61_v8 = vmul.f32 %v598_v4, %v762_v2  ;;  %s658_s18 = smov 126   ;;  %v799_v51 = vshrl.u32 %v133_v48, 7 }
   0x3   :  { %v784_v22 = vld [vmem:[%s953_s1] sm:$0xf]  ;;  %s659_s1 = smov 4   ;;  %s660_s19 = smov 124  }
   0x4   :  { %s661_s20 = smov 8   ;;  %s662_s13 = smov 120   ;;  %v139_v44 = vld [vmem:[%s954_s6] sm:$0xff]  ;;  %v802_v55 = vsub.s32 0, %v799_v51 }
   0x8   :  { %v69_v1 = vld [vmem:[%s967_s21] sm:$0xff] }
   0x9   :  { %72 = vperm.xlu0 %622, %v69_v1  }
   0xd   :  { %55 = vrot.lane.b32.xlu0 %v762_v2, %s656_s25 }
  0x74   :  { %v64_v7 = vpop.permute.xlu1 %63 }
  0x75   :  { %v67_v11 = vmul.f32 %v599_v6, %v64_v7 }
  0x88   :  { %v73_v3 = vpop.permute.xlu0 %72 }
  0x8c   :  { %v56_v9 = vpop.permute.xlu0 %55 }
  0x8d   :  { %v58_v10 = vmul.f32 %v57_v5, %v56_v9 }
  0x8f   :  { %v62_v12 = vadd.f32 %v61_v8, %v58_v10 }
  0x91   :  { %v68_v13 = vadd.f32 %v67_v11, %v62_v12 }
  0x93   :  { %v75_v14 = vadd.f32 %v73_v3, %v68_v13 }
  0x95   :  { %v76_v15 = vrot.slane %v75_v14, 4 }
  0x97   :  { %v77_v16 = vadd.f32 %v76_v15, %v75_v14 }
  0x99   :  { %v78_v17 = vrot.slane %v77_v16, 2 }
  0x9b   :  { %v79_v18 = vadd.f32 %v78_v17, %v77_v16 }
  0x9d   :  { %v80_v19 = vrot.slane %v79_v18, 1 }
  0x9f   :  { %v81_v20 = vadd.f32 %v80_v19, %v79_v18 }
  0xa1   :  { %84 = vrot.lane.b32.xlu0 %v81_v20, %s656_s25  ;;  %82 = vrot.lane.b32.xlu1 %v81_v20, %s655_s24 }
 0x113   :  { %v85_v21 = vpop.permute.xlu0 %84  ;;  %v83_v23 = vpop.permute.xlu1 %82 }
 0x114   :  { %v87_v24 = vsub.f32 %v83_v23, %v85_v21  ;;  %v86_v25 = vadd.f32 %v85_v21, %v81_v20  ;;  %v663_v20 = vmov 1  }
 0x116   :  { %v88_v26 = vmul.f32 %v87_v24, %v784_v22 }
 0x118   :  { %v89_v27 = vadd.f32 %v88_v26, %v86_v25 }
 0x11a   :  { %92 = vrot.lane.b32.xlu0 %v89_v27, %s657_s17  ;;  %90 = vrot.lane.b32.xlu1 %v89_v27, %s658_s18 }
 0x18c   :  { %v93_v28 = vpop.permute.xlu0 %92  ;;  %v91_v29 = vpop.permute.xlu1 %90 }
 0x18d   :  { %v95_v30 = vsub.f32 %v91_v29, %v93_v28  ;;  %v94_v33 = vadd.f32 %v93_v28, %v89_v27 }
 0x18f   :  { %v97_v31 = vrot.slane %v95_v30, 7  ;;  %v214_v30 = vld [vmem:[%s955_s7] sm:$0xff] }
 0x191   :  { %v99_v32 = vmul.f32 %v97_v31, %v784_v22  ;;  %v664_v31 = vmov 3  }
 0x193   :  { %v101_v34 = vrot.slane %v99_v32, 1  ;;  %v665_v32 = vmov 2  }
 0x195   :  { %v103_v35 = vadd.f32 %v101_v34, %v94_v33  ;;  %v666_v33 = vmov 4   ;;  %v667_v34 = vmov 5  }
 0x197   :  { %106 = vrot.lane.b32.xlu0 %v103_v35, %s659_s1  ;;  %104 = vrot.lane.b32.xlu1 %v103_v35, %s660_s19 }
 0x209   :  { %v107_v36 = vpop.permute.xlu0 %106  ;;  %v105_v37 = vpop.permute.xlu1 %104 }
 0x20a   :  { %v109_v38 = vsub.f32 %v105_v37, %v107_v36  ;;  %v108_v41 = vadd.f32 %v107_v36, %v103_v35  ;;  %v295_v35 = vld [vmem:[%s956_s8] sm:$0xff]  ;;  %v668_v36 = vmov 6   ;;  %v669_v37 = vmov 7  }
 0x20c   :  { %v111_v39 = vrot.slane %v109_v38, 6  ;;  %v341_v38 = vld [vmem:[%s957_s10] sm:$0xff] }
 0x20e   :  { %v113_v40 = vmul.f32 %v111_v39, %v784_v22 }
 0x210   :  { %v115_v42 = vrot.slane %v113_v40, 2 }
 0x212   :  { %v117_v43 = vadd.f32 %v115_v42, %v108_v41 }
 0x214   :  { %120 = vrot.lane.b32.xlu0 %v117_v43, %s661_s20  ;;  %118 = vrot.lane.b32.xlu1 %v117_v43, %s662_s13 }
 0x218   :  { %142 = vperm.xlu1 %623, %v139_v44  }
 0x21c   :  { %624 = vset.pattern.permute.xlu1 %v663_v20 }
 0x286   :  { %v121_v45 = vpop.permute.xlu0 %120  ;;  %v119_v46 = vpop.permute.xlu1 %118 }
 0x287   :  { %v123_v47 = vsub.f32 %v119_v46, %v121_v45  ;;  %v122_v52 = vadd.f32 %v121_v45, %v117_v43 }
 0x289   :  { %v125_v49 = vrot.slane %v123_v47, 5 }
 0x28b   :  { %v127_v50 = vmul.f32 %v125_v49, %v784_v22 }
 0x28d   :  { %v129_v53 = vrot.slane %v127_v50, 3 }
 0x28f   :  { %v131_v54 = vadd.f32 %v129_v53, %v122_v52  ;;  %v210_v53 = vld [vmem:[%s958_s4] sm:$0xff] }
 0x291   :  { %v132_v56 = vmul.f32 0.015625, %v131_v54 }
 0x293   :  { %v136_v57 = vrot.slane %v132_v56, %v802_v55 }
 0x295   :  { %v805_v58 = vsub.f32 %v75_v14, %v136_v57  ;;  %v212_v57 = vld [vmem:[%s959_s5] sm:$0xff] }
 0x297   :  { %v138_v59 = vmul.f32 %v805_v58, %v805_v58  ;;  %v143_v60 = vpop.permute.xlu1 %142 }
 0x299   :  { %v145_v61 = vmul.f32 %v143_v60, %v138_v59  ;;  %v231_v60 = vsub.s32 1, %v799_v51 }
 0x29b   :  { %v146_v62 = vrot.slane %v145_v61, 4 }
 0x29d   :  { %v147_v63 = vadd.f32 %v146_v62, %v145_v61  ;;  %v241_v62 = vsub.s32 2, %v799_v51 }
 0x29f   :  { %v148_v1 = vrot.slane %v147_v63, 2 }
 0x2a1   :  { %v149_v3 = vadd.f32 %v148_v1, %v147_v63  ;;  %v251_v1 = vsub.s32 3, %v799_v51 }
 0x2a3   :  { %v150_v4 = vrot.slane %v149_v3, 1 }
 0x2a5   :  { %v151_v5 = vadd.f32 %v150_v4, %v149_v3 }
 0x2a7   :  { %154 = vrot.lane.b32.xlu1 %v151_v5, %s656_s25  ;;  %152 = vrot.lane.b32.xlu0 %v151_v5, %s655_s24 }
 0x319   :  { %v155_v6 = vpop.permute.xlu1 %154  ;;  %v153_v7 = vpop.permute.xlu0 %152 }
 0x31a   :  { %v157_v8 = vsub.f32 %v153_v7, %v155_v6  ;;  %v156_v9 = vadd.f32 %v155_v6, %v151_v5 }
 0x31c   :  { %v158_v10 = vmul.f32 %v157_v8, %v784_v22 }
 0x31e   :  { %v159_v11 = vadd.f32 %v158_v10, %v156_v9 }
 0x320   :  { %162 = vrot.lane.b32.xlu1 %v159_v11, %s657_s17  ;;  %160 = vrot.lane.b32.xlu0 %v159_v11, %s658_s18 }
 0x392   :  { %v163_v12 = vpop.permute.xlu1 %162  ;;  %v161_v13 = vpop.permute.xlu0 %160 }
 0x393   :  { %v165_v14 = vsub.f32 %v161_v13, %v163_v12  ;;  %v164_v17 = vadd.f32 %v163_v12, %v159_v11  ;;  %v271_v11 = vsub.s32 5, %v799_v51 }
 0x395   :  { %v167_v15 = vrot.slane %v165_v14, 7 }
 0x397   :  { %v169_v16 = vmul.f32 %v167_v15, %v784_v22  ;;  %v281_v15 = vsub.s32 6, %v799_v51 }
 0x399   :  { %v171_v18 = vrot.slane %v169_v16, 1 }
 0x39b   :  { %v173_v19 = vadd.f32 %v171_v18, %v164_v17 }
 0x39d   :  { %176 = vrot.lane.b32.xlu1 %v173_v19, %s659_s1  ;;  %174 = vrot.lane.b32.xlu0 %v173_v19, %s660_s19 }
 0x40f   :  { %v177_v21 = vpop.permute.xlu1 %176  ;;  %v175_v23 = vpop.permute.xlu0 %174 }
 0x410   :  { %v179_v24 = vsub.f32 %v175_v23, %v177_v21  ;;  %v178_v27 = vadd.f32 %v177_v21, %v173_v19 }
 0x412   :  { %v181_v25 = vrot.slane %v179_v24, 6 }
 0x414   :  { %v183_v26 = vmul.f32 %v181_v25, %v784_v22  ;;  %v291_v25 = vsub.s32 7, %v799_v51 }
 0x416   :  { %v185_v28 = vrot.slane %v183_v26, 2 }
 0x418   :  { %v187_v29 = vadd.f32 %v185_v28, %v178_v27 }
 0x41a   :  { %190 = vrot.lane.b32.xlu1 %v187_v29, %s661_s20  ;;  %188 = vrot.lane.b32.xlu0 %v187_v29, %s662_s13 }
 0x41e   :  { %226 = vperm.xlu1 %624, %v214_v30   ;;  %217 = vperm.xlu0 %622, %v214_v30  }
 0x422   :  { %626 = vset.pattern.permute.xlu1 %v664_v31  ;;  %625 = vset.pattern.permute.xlu0 %v665_v32 }
 0x423   :  { %246 = vperm.xlu1 %626, %v214_v30   ;;  %236 = vperm.xlu0 %625, %v214_v30  }
 0x427   :  { %627 = vset.pattern.permute.xlu1 %v666_v33  ;;  %628 = vset.pattern.permute.xlu0 %v667_v34 }
 0x428   :  { %256 = vperm.xlu1 %627, %v214_v30   ;;  %266 = vperm.xlu0 %628, %v214_v30  }
 0x42c   :  { %629 = vset.pattern.permute.xlu1 %v668_v36  ;;  %631 = vset.pattern.permute.xlu0 %v654_v0 }
 0x42d   :  { %276 = vperm.xlu1 %629, %v214_v30   ;;  %298 = vperm.xlu0 %631, %v295_v35  }
 0x431   :  { %630 = vset.pattern.permute.xlu1 %v669_v37  ;;  %633 = vset.pattern.permute.xlu0 %v663_v20 }
 0x432   :  { %286 = vperm.xlu1 %630, %v214_v30  }
 0x436   :  { %632 = vset.pattern.permute.xlu1 %v654_v0 }
 0x437   :  { %344 = vperm.xlu1 %632, %v341_v38  }
 0x48c   :  { %v191_v39 = vpop.permute.xlu1 %190  ;;  %v189_v40 = vpop.permute.xlu0 %188 }
 0x48d   :  { %v193_v41 = vsub.f32 %v189_v40, %v191_v39  ;;  %v192_v44 = vadd.f32 %v191_v39, %v187_v29 }
 0x48f   :  { %v195_v42 = vrot.slane %v193_v41, 5 }
 0x491   :  { %v197_v43 = vmul.f32 %v195_v42, %v784_v22 }
 0x493   :  { %v199_v45 = vrot.slane %v197_v43, 3 }
 0x495   :  { %v201_v46 = vadd.f32 %v199_v45, %v192_v44 }
 0x497   :  { %v202_v47 = vmul.f32 0.015625, %v201_v46 }
 0x499   :  { %v203_v48 = vadd.f32 1e-05, %v202_v47 }
 0x49b   :  { %642 = vrsqrt.f32 %v203_v48 }
 0x49d   :  { %v227_v49 = vpop.permute.xlu1 %226  ;;  %v218_v61 = vpop.permute.xlu0 %217 }
 0x4a2   :  { %v247_v54 = vpop.permute.xlu1 %246  ;;  %v237_v7 = vpop.permute.xlu0 %236 }
 0x4a5   :  { %v643_v50 = vpop.eup %642 }
 0x4a6   :  { %v208_v52 = vrot.slane %v643_v50, %v802_v55 }
 0x4a7   :  { %v257_v3 = vpop.permute.xlu1 %256  ;;  %v267_v20 = vpop.permute.xlu0 %266 }
 0x4a8   :  { %v209_v56 = vmul.f32 %v208_v52, %v805_v58  ;;  %v261_v58 = vsub.s32 4, %v799_v51 }
 0x4aa   :  { %v211_v59 = vmul.f32 %v210_v53, %v209_v56 }
 0x4ac   :  { %v213_v63 = vadd.f32 %v212_v57, %v211_v59  ;;  %v277_v16 = vpop.permute.xlu1 %276  ;;  %v299_v40 = vpop.permute.xlu0 %298 }
 0x4ae   :  { %v223_v4 = vrot.slane %v213_v63, %v802_v55  ;;  %v232_v5 = vrot.slane %v213_v63, %v231_v60  ;;  %v242_v6 = vrot.slane %v213_v63, %v241_v62  ;;  %v252_v10 = vrot.slane %v213_v63, %v251_v1 }
 0x4af   :  { %v262_v13 = vrot.slane %v213_v63, %v261_v58  ;;  %v272_v19 = vrot.slane %v213_v63, %v271_v11  ;;  %v282_v24 = vrot.slane %v213_v63, %v281_v15  ;;  %v292_v35 = vrot.slane %v213_v63, %v291_v25 }
 0x4b0   :  { %v224_v8 = vmul.f32 %v223_v4, %v218_v61  ;;  %v233_v9 = vmul.f32 %v232_v5, %v227_v49  ;;  %v243_v14 = vmul.f32 %v242_v6, %v237_v7  ;;  %v253_v17 = vmul.f32 %v252_v10, %v247_v54 }
 0x4b1   :  { %v263_v21 = vmul.f32 %v262_v13, %v257_v3  ;;  %v273_v27 = vmul.f32 %v272_v19, %v267_v20  ;;  %v287_v28 = vpop.permute.xlu1 %286  ;;  %v283_v29 = vmul.f32 %v282_v24, %v277_v16  ;;  %v602_v13 = vld [vmem:[%s960_s9 + $0x8] sm:$0xff] }
 0x4b2   :  { %v234_v12 = vadd.f32 %v233_v9, %v224_v8  ;;  %v293_v38 = vmul.f32 %v292_v35, %v287_v28 }
 0x4b4   :  { %v244_v18 = vadd.f32 %v243_v14, %v234_v12  ;;  %v329_v12 = vld [vmem:[%s960_s9] sm:$0xff]  ;;  %v603_v14 = vld [vmem:[%s960_s9 + $0x10] sm:$0xff] }
 0x4b6   :  { %v254_v23 = vadd.f32 %v253_v17, %v244_v18  ;;  %v345_v10 = vpop.permute.xlu1 %344 }
 0x4b8   :  { %v264_v26 = vadd.f32 %v263_v21, %v254_v23 }
 0x4ba   :  { %v274_v30 = vadd.f32 %v273_v27, %v264_v26 }
 0x4bc   :  { %v284_v39 = vadd.f32 %v283_v29, %v274_v30 }
 0x4be   :  { %v294_v41 = vadd.f32 %v293_v38, %v284_v39 }
 0x4c0   :  { %v301_v42 = vadd.f32 %v299_v40, %v294_v41 }
 0x4c2   :  { %v302_v43 = vmul.f32 0.70710677, %v301_v42 }
 0x4c4   :  { %v303_v44 = vand.u32 2147483647, %v302_v43  ;;  %vm323_vm0 = vcmp.ge.f32.partialorder %v302_v43, 0.0 }
 0x4c6   :  { %v304_v45 = vmul.f32 0.3275911, %v303_v44  ;;  %v318_v47 = vsub.f32 0.0, %v303_v44 }
 0x4c8   :  { %v305_v46 = vadd.f32 1.0, %v304_v45  ;;  %v319_v50 = vmul.f32 %v318_v47, %v303_v44 }
 0x4ca   :  { %644 = vrcp.f32 %v305_v46  ;;  %v320_v54 = vmul.f32 1.442695, %v319_v50 }
 0x4cc   :  { %646 = vpow2.f32 %v320_v54 }
 0x4d4   :  { %v645_v48 = vpop.eup %644 }
 0x4d5   :  { %v308_v49 = vmul.f32 1.0614054, %v645_v48 }
 0x4d6   :  { %v647_v5 = vpop.eup %646 }
 0x4d7   :  { %v600_v52 = vadd.f32 -1.4531521, %v308_v49 }
 0x4d9   :  { %v310_v53 = vmul.f32 %v645_v48, %v600_v52 }
 0x4db   :  { %v311_v56 = vadd.f32 1.4214138, %v310_v53 }
 0x4dd   :  { %v312_v57 = vmul.f32 %v645_v48, %v311_v56 }
 0x4df   :  { %v601_v59 = vadd.f32 -0.28449672, %v312_v57 }
 0x4e1   :  { %v314_v61 = vmul.f32 %v645_v48, %v601_v59 }
 0x4e3   :  { %v315_v63 = vadd.f32 0.2548296, %v314_v61 }
 0x4e5   :  { %v316_v3 = vmul.f32 %v645_v48, %v315_v63 }
 0x4e7   :  { %v317_v4 = vmul.f32 0.5, %v316_v3 }
 0x4e9   :  { %v322_v6 = vmul.f32 %v647_v5, %v317_v4 }
 0x4eb   :  { %v324_v7 = vsub.f32 1.0, %v322_v6 }
 0x4ed   :  { %v325_v8 = vsel %vm323_vm0, %v324_v7, %v322_v6 }
 0x4ee   :  { %v326_v9 = vmul.f32 %v325_v8, %v301_v42 }
 0x4f0   :  { %335 = vrot.lane.b32.xlu0 %v326_v9, %s655_s24  ;;  %327 = vrot.lane.b32.xlu1 %v326_v9, %s656_s25  ;;  %v333_v19 = vmul.f32 %v602_v13, %v326_v9 }
 0x562   :  { %v336_v16 = vpop.permute.xlu0 %335  ;;  %v328_v17 = vpop.permute.xlu1 %327 }
 0x563   :  { %v330_v18 = vmul.f32 %v329_v12, %v328_v17  ;;  %v339_v20 = vmul.f32 %v603_v14, %v336_v16 }
 0x565   :  { %v334_v21 = vadd.f32 %v333_v19, %v330_v18 }
 0x567   :  { %v340_v23 = vadd.f32 %v339_v20, %v334_v21 }
 0x569   :  { %v347_v24 = vadd.f32 %v345_v10, %v340_v23 }
 0x56b   :  { %v348_v26 = vrot.slane %v347_v24, 4 }
 0x56d   :  { %v349_v27 = vadd.f32 %v348_v26, %v347_v24 }
 0x56f   :  { %v350_v28 = vrot.slane %v349_v27, 2 }
 0x571   :  { %v351_v29 = vadd.f32 %v350_v28, %v349_v27 }
 0x573   :  { %v352_v30 = vrot.slane %v351_v29, 1 }
 0x575   :  { %v353_v35 = vadd.f32 %v352_v30, %v351_v29 }
 0x577   :  { %356 = vrot.lane.b32.xlu0 %v353_v35, %s656_s25  ;;  %354 = vrot.lane.b32.xlu1 %v353_v35, %s655_s24 }
 0x5e9   :  { %v357_v38 = vpop.permute.xlu0 %356  ;;  %v355_v39 = vpop.permute.xlu1 %354 }
 0x5ea   :  { %v359_v40 = vsub.f32 %v355_v39, %v357_v38  ;;  %v358_v41 = vadd.f32 %v357_v38, %v353_v35 }
 0x5ec   :  { %v360_v42 = vmul.f32 %v359_v40, %v784_v22 }
 0x5ee   :  { %v361_v43 = vadd.f32 %v360_v42, %v358_v41 }
 0x5f0   :  { %364 = vrot.lane.b32.xlu0 %v361_v43, %s657_s17  ;;  %362 = vrot.lane.b32.xlu1 %v361_v43, %s658_s18 }
 0x662   :  { %v365_v44 = vpop.permute.xlu0 %364  ;;  %v363_v45 = vpop.permute.xlu1 %362 }
 0x663   :  { %v367_v46 = vsub.f32 %v363_v45, %v365_v44  ;;  %v366_v49 = vadd.f32 %v365_v44, %v361_v43 }
 0x665   :  { %v369_v47 = vrot.slane %v367_v46, 7 }
 0x667   :  { %v371_v48 = vmul.f32 %v369_v47, %v784_v22 }
 0x669   :  { %v373_v50 = vrot.slane %v371_v48, 1 }
 0x66b   :  { %v375_v52 = vadd.f32 %v373_v50, %v366_v49 }
 0x66d   :  { %378 = vrot.lane.b32.xlu0 %v375_v52, %s659_s1  ;;  %376 = vrot.lane.b32.xlu1 %v375_v52, %s660_s19 }
 0x6df   :  { %v379_v53 = vpop.permute.xlu0 %378  ;;  %v377_v54 = vpop.permute.xlu1 %376 }
 0x6e0   :  { %v381_v56 = vsub.f32 %v377_v54, %v379_v53  ;;  %v380_v61 = vadd.f32 %v379_v53, %v375_v52 }
 0x6e2   :  { %v383_v57 = vrot.slane %v381_v56, 6  ;;  %v479_v56 = vld [vmem:[%s961_s14] sm:$0xff] }
 0x6e4   :  { %v385_v59 = vmul.f32 %v383_v57, %v784_v22 }
 0x6e6   :  { %v387_v63 = vrot.slane %v385_v59, 2 }
 0x6e8   :  { %v389_v3 = vadd.f32 %v387_v63, %v380_v61 }
 0x6ea   :  { %392 = vrot.lane.b32.xlu0 %v389_v3, %s661_s20  ;;  %390 = vrot.lane.b32.xlu1 %v389_v3, %s662_s13 }
 0x75c   :  { %v393_v4 = vpop.permute.xlu0 %392  ;;  %v391_v5 = vpop.permute.xlu1 %390 }
 0x75d   :  { %v395_v6 = vsub.f32 %v391_v5, %v393_v4  ;;  %v394_v9 = vadd.f32 %v393_v4, %v389_v3 }
 0x75f   :  { %v397_v7 = vrot.slane %v395_v6, 5 }
 0x761   :  { %v399_v8 = vmul.f32 %v397_v7, %v784_v22 }
 0x763   :  { %v401_v10 = vrot.slane %v399_v8, 3 }
 0x765   :  { %v403_v12 = vadd.f32 %v401_v10, %v394_v9 }
 0x767   :  { %v404_v13 = vmul.f32 0.0078125, %v403_v12 }
 0x769   :  { %v408_v14 = vrot.slane %v404_v13, %v802_v55 }
 0x76b   :  { %v892_v16 = vsub.f32 %v347_v24, %v408_v14 }
 0x76d   :  { %v410_v17 = vmul.f32 %v892_v16, %v892_v16 }
 0x76f   :  { %v411_v18 = vrot.slane %v410_v17, 4 }
 0x771   :  { %v412_v19 = vadd.f32 %v411_v18, %v410_v17 }
 0x773   :  { %v413_v20 = vrot.slane %v412_v19, 2 }
 0x775   :  { %v414_v21 = vadd.f32 %v413_v20, %v412_v19 }
 0x777   :  { %v415_v23 = vrot.slane %v414_v21, 1 }
 0x779   :  { %v416_v26 = vadd.f32 %v415_v23, %v414_v21 }
 0x77b   :  { %419 = vrot.lane.b32.xlu0 %v416_v26, %s656_s25  ;;  %417 = vrot.lane.b32.xlu1 %v416_v26, %s655_s24 }
 0x7ed   :  { %v420_v27 = vpop.permute.xlu0 %419  ;;  %v418_v28 = vpop.permute.xlu1 %417 }
 0x7ee   :  { %v422_v29 = vsub.f32 %v418_v28, %v420_v27  ;;  %v421_v30 = vadd.f32 %v420_v27, %v416_v26 }
 0x7f0   :  { %v423_v24 = vmul.f32 %v422_v29, %v784_v22 }
 0x7f2   :  { %v424_v35 = vadd.f32 %v423_v24, %v421_v30 }
 0x7f4   :  { %427 = vrot.lane.b32.xlu0 %v424_v35, %s657_s17  ;;  %425 = vrot.lane.b32.xlu1 %v424_v35, %s658_s18 }
 0x866   :  { %v428_v38 = vpop.permute.xlu0 %427  ;;  %v426_v39 = vpop.permute.xlu1 %425 }
 0x867   :  { %v430_v40 = vsub.f32 %v426_v39, %v428_v38  ;;  %v429_v43 = vadd.f32 %v428_v38, %v424_v35 }
 0x869   :  { %v432_v41 = vrot.slane %v430_v40, 7 }
 0x86b   :  { %v434_v42 = vmul.f32 %v432_v41, %v784_v22 }
 0x86d   :  { %v436_v44 = vrot.slane %v434_v42, 1 }
 0x86f   :  { %v438_v45 = vadd.f32 %v436_v44, %v429_v43 }
 0x871   :  { %441 = vrot.lane.b32.xlu0 %v438_v45, %s659_s1  ;;  %439 = vrot.lane.b32.xlu1 %v438_v45, %s660_s19 }
 0x8e3   :  { %v442_v46 = vpop.permute.xlu0 %441  ;;  %v440_v47 = vpop.permute.xlu1 %439 }
 0x8e4   :  { %v444_v48 = vsub.f32 %v440_v47, %v442_v46  ;;  %v443_v52 = vadd.f32 %v442_v46, %v438_v45 }
 0x8e6   :  { %v446_v49 = vrot.slane %v444_v48, 6 }
 0x8e8   :  { %v448_v50 = vmul.f32 %v446_v49, %v784_v22 }
 0x8ea   :  { %v450_v53 = vrot.slane %v448_v50, 2 }
 0x8ec   :  { %v452_v54 = vadd.f32 %v450_v53, %v443_v52 }
 0x8ee   :  { %455 = vrot.lane.b32.xlu0 %v452_v54, %s661_s20  ;;  %453 = vrot.lane.b32.xlu1 %v452_v54, %s662_s13 }
 0x8f2   :  { %482 = vperm.xlu1 %632, %v479_v56   ;;  %491 = vperm.xlu0 %633, %v479_v56  }
 0x8f6   :  { %634 = vset.pattern.permute.xlu1 %v665_v32  ;;  %636 = vset.pattern.permute.xlu0 %v666_v33  ;;  %v560_v32 = vld [vmem:[%s962_s15] sm:$0xff] }
 0x8f7   :  { %501 = vperm.xlu1 %634, %v479_v56   ;;  %521 = vperm.xlu0 %636, %v479_v56  }
 0x8fb   :  { %635 = vset.pattern.permute.xlu1 %v664_v31  ;;  %639 = vset.pattern.permute.xlu0 %v669_v37 }
 0x8fc   :  { %511 = vperm.xlu1 %635, %v479_v56   ;;  %551 = vperm.xlu0 %639, %v479_v56  }
 0x900   :  { %637 = vset.pattern.permute.xlu1 %v667_v34  ;;  %641 = vset.pattern.permute.xlu0 %v654_v0 }
 0x901   :  { %531 = vperm.xlu1 %637, %v479_v56  }
 0x905   :  { %638 = vset.pattern.permute.xlu1 %v668_v36 }
 0x906   :  { %541 = vperm.xlu1 %638, %v479_v56  }
 0x90a   :  { %640 = vset.pattern.permute.xlu1 %v654_v0  ;;  %v475_v0 = vld [vmem:[%s963_s11] sm:$0xff] }
 0x90b   :  { %563 = vperm.xlu1 %640, %v560_v32  }
 0x960   :  { %v456_v31 = vpop.permute.xlu0 %455  ;;  %v454_v33 = vpop.permute.xlu1 %453 }
 0x961   :  { %v458_v37 = vsub.f32 %v454_v33, %v456_v31  ;;  %v457_v34 = vadd.f32 %v456_v31, %v452_v54 }
 0x963   :  { %v460_v57 = vrot.slane %v458_v37, 5 }
 0x965   :  { %v462_v59 = vmul.f32 %v460_v57, %v784_v22  ;;  %v477_v22 = vld [vmem:[%s964_s12] sm:$0xff] }
 0x967   :  { %v464_v61 = vrot.slane %v462_v59, 3 }
 0x969   :  { %v466_v63 = vadd.f32 %v464_v61, %v457_v34 }
 0x96b   :  { %v467_v3 = vmul.f32 0.0078125, %v466_v63 }
 0x96d   :  { %v468_v4 = vadd.f32 1e-05, %v467_v3 }
 0x96f   :  { %648 = vrsqrt.f32 %v468_v4 }
 0x971   :  { %v483_v36 = vpop.permute.xlu1 %482  ;;  %v492_v13 = vpop.permute.xlu0 %491 }
 0x976   :  { %v502_v6 = vpop.permute.xlu1 %501  ;;  %v522_v28 = vpop.permute.xlu0 %521 }
 0x979   :  { %v649_v5 = vpop.eup %648 }
 0x97a   :  { %v473_v7 = vrot.slane %v649_v5, %v802_v55 }
 0x97b   :  { %v512_v10 = vpop.permute.xlu1 %511  ;;  %v552_v40 = vpop.permute.xlu0 %551 }
 0x97c   :  { %v474_v8 = vmul.f32 %v473_v7, %v892_v16 }
 0x97e   :  { %v476_v9 = vmul.f32 %v475_v0, %v474_v8 }
 0x980   :  { %v478_v12 = vadd.f32 %v477_v22, %v476_v9  ;;  %v532_v21 = vpop.permute.xlu1 %531 }
 0x982   :  { %v488_v14 = vrot.slane %v478_v12, %v802_v55  ;;  %v507_v17 = vrot.slane %v478_v12, %v241_v62  ;;  %v497_v18 = vrot.slane %v478_v12, %v231_v60  ;;  %v517_v16 = vrot.slane %v478_v12, %v251_v1 }
 0x983   :  { %v527_v27 = vrot.slane %v478_v12, %v261_v58  ;;  %v537_v62 = vrot.slane %v478_v12, %v271_v11  ;;  %v557_v1 = vrot.slane %v478_v12, %v291_v25  ;;  %v547_v39 = vrot.slane %v478_v12, %v281_v15 }
 0x984   :  { %v489_v19 = vmul.f32 %v488_v14, %v483_v36  ;;  %v498_v20 = vmul.f32 %v497_v18, %v492_v13  ;;  %v508_v23 = vmul.f32 %v507_v17, %v502_v6  ;;  %v518_v55 = vmul.f32 %v517_v16, %v512_v10 }
 0x985   :  { %v528_v24 = vmul.f32 %v527_v27, %v522_v28  ;;  %v542_v60 = vpop.permute.xlu1 %541  ;;  %v538_v38 = vmul.f32 %v537_v62, %v532_v21  ;;  %v558_v42 = vmul.f32 %v557_v1, %v552_v40 }
 0x986   :  { %v499_v26 = vadd.f32 %v498_v20, %v489_v19  ;;  %v548_v58 = vmul.f32 %v547_v39, %v542_v60 }
 0x988   :  { %v509_v29 = vadd.f32 %v508_v23, %v499_v26 }
 0x98a   :  { %v519_v30 = vadd.f32 %v518_v55, %v509_v29  ;;  %v564_v44 = vpop.permute.xlu1 %563 }
 0x98c   :  { %v529_v35 = vadd.f32 %v528_v24, %v519_v30 }
 0x98e   :  { %v539_v41 = vadd.f32 %v538_v38, %v529_v35 }
 0x990   :  { %v549_v43 = vadd.f32 %v548_v58, %v539_v41 }
 0x992   :  { %v559_v45 = vadd.f32 %v558_v42, %v549_v43 }
 0x994   :  { %v566_v46 = vadd.f32 %v564_v44, %v559_v45 }
 0x996   :  { %v567_v11 = vmul.f32 0.70710677, %v566_v46 }
 0x998   :  { %v568_v47 = vand.u32 2147483647, %v567_v11  ;;  %vm588_vm1 = vcmp.ge.f32.partialorder %v567_v11, 0.0 }
 0x99a   :  { %v569_v48 = vmul.f32 0.3275911, %v568_v47  ;;  %v583_v50 = vsub.f32 0.0, %v568_v47 }
 0x99c   :  { %v570_v49 = vadd.f32 1.0, %v569_v48  ;;  %v584_v25 = vmul.f32 %v583_v50, %v568_v47 }
 0x99e   :  { %650 = vrcp.f32 %v570_v49  ;;  %v585_v15 = vmul.f32 1.442695, %v584_v25 }
 0x9a0   :  { %652 = vpow2.f32 %v585_v15 }
 0x9a8   :  { %v651_v52 = vpop.eup %650 }
 0x9a9   :  { %v573_v53 = vmul.f32 1.0614054, %v651_v52 }
 0x9aa   :  { %v653_v34 = vpop.eup %652 }
 0x9ab   :  { %v604_v54 = vadd.f32 -1.4531521, %v573_v53 }
 0x9ad   :  { %v575_v51 = vmul.f32 %v651_v52, %v604_v54 }
 0x9af   :  { %v576_v56 = vadd.f32 1.4214138, %v575_v51 }
 0x9b1   :  { %v577_v32 = vmul.f32 %v651_v52, %v576_v56 }
 0x9b3   :  { %v605_v31 = vadd.f32 -0.28449672, %v577_v32 }
 0x9b5   :  { %v579_v33 = vmul.f32 %v651_v52, %v605_v31 }
 0x9b7   :  { %v580_v37 = vadd.f32 0.2548296, %v579_v33 }
 0x9b9   :  { %v581_v57 = vmul.f32 %v651_v52, %v580_v37 }
 0x9bb   :  { %v582_v59 = vmul.f32 0.5, %v581_v57 }
 0x9bd   :  { %v587_v61 = vmul.f32 %v653_v34, %v582_v59 }
 0x9bf   :  { %v589_v63 = vsub.f32 1.0, %v587_v61 }
 0x9c1   :  { %v590_v3 = vsel %vm588_vm1, %v589_v63, %v587_v61 }
 0x9c2   :  { %v591_v4 = vmul.f32 %v590_v3, %v566_v46 }
 0x9c4   :  { %v592_v36 = vadd.f32 %v591_v4, %v762_v2 }
 0x9c6   :  { %593 = vst [vmem:[%s965_s16] sm:$0xff] %v592_v36 }

</bundles_post_ra>
